<compile_context>
chip_gen: v7x
topology: tpu7x:2x2x1
jax: 0.10.0
libtpu: 0.0.40
codegen_flags: <defaults>
</compile_context>

<pallas_src>
import math

import jax
import jax.numpy as jnp
import numpy as np
from jax.experimental import pallas as pl
from jax.experimental.pallas import tpu as pltpu

K = 4        # kernel size
STRIDE = 2
PAD = 1      # ConvTranspose2d padding


# ---------------------------------------------------------------------------
# Pallas kernel factory (closes over static geometry).
# ---------------------------------------------------------------------------
def _make_kernel(H, W, Ci2):
    HW = H * W

    def kernel(x_ref, w_ref, b_ref, o_ref, col_ref):
        # x_ref:   (1, Ci2, FLAT)    bf16  row-padded, flattened, end-padded input
        # w_ref:   (4*Co2, 9*Ci2)    bf16  all 4 phase weights fused along rows
        # b_ref:   (4*Co2, 1)        f32   complex-block bias per phase row
        # o_ref:   (1, 4*Co2, HW)    f32   all 4 phases, lane-dense (HW lanes)
        # col_ref: (9*Ci2, HW)       bf16  shared im2col, rebuilt per image
        x = x_ref[0]                                          # (Ci2, FLAT)

        # Column-boundary masks (shared by all taps); hoisted out of the loop.
        b_idx = jax.lax.broadcasted_iota(jnp.int32, (Ci2, HW), 1) % W
        left_ok = b_idx >= 1          # valid lanes when column shift sx == 0
        right_ok = b_idx <= W - 2     # valid lanes when column shift sx == 2

        # 9 shared shift windows (static slices -> lane rolls/selects, no DMA).
        for sy in range(3):
            for sx in range(3):
                start = sy * W + sx                           # static offset
                xs = x[:, start:start + HW]                   # (Ci2, HW) bf16
                if sx == 0:
                    xs = jnp.where(left_ok, xs.astype(jnp.float32),
                                   0.0).astype(jnp.bfloat16)
                elif sx == 2:
                    xs = jnp.where(right_ok, xs.astype(jnp.float32),
                                   0.0).astype(jnp.bfloat16)
                t = sy * 3 + sx
                col_ref[t * Ci2:(t + 1) * Ci2, :] = xs

        # Single fused MXU matmul for all 4 phases; f32 accumulation.
        res = jnp.dot(w_ref[...], col_ref[...],
                      preferred_element_type=jnp.float32)     # (4*Co2, HW)
        o_ref[0] = res + b_ref[...]

    return kernel


# ---------------------------------------------------------------------------
# Forward wrapper: complex NCHW in -> complex NCHW out (spatial x2).
# ---------------------------------------------------------------------------
@jax.jit
def cup2_forward(x, wr, wi, br, bi):
    """Mirror of CUp2.forward.
    x: (N, Cin, H, W) complex.  wr, wi: (Cin, Cout, K, K) torch layout.
    br, bi: (Cout,).  Returns (N, Cout, 2H, 2W) complex64."""
    N, Cin, H, W = x.shape
    Cout = wr.shape[1]
    Ci2, Co2 = 2 * Cin, 2 * Cout
    HW = H * W
    FLAT = HW + 2 * W + 2

    # Pack complex input as channels [real | imag] in bf16, then one jnp.pad:
    # padding the flattened spatial axis by (W+1) on each side == one zero row
    # above/below plus one extra element front/back, so every static 3x3 shift
    # window of the kernel stays in bounds.
    xr = jnp.real(x).astype(jnp.float32)
    xi = jnp.imag(x).astype(jnp.float32)
    x_pack = jnp.concatenate([xr, xi], axis=1).astype(jnp.bfloat16)  # (N,Ci2,H,W)
    x_flat = jnp.pad(x_pack.reshape(N, Ci2, HW),
                     ((0, 0), (0, 0), (W + 1, W + 1)))               # (N,Ci2,FLAT)

    # Complex block weight [[Wr, Wi], [-Wi, Wr]] in (ky, kx, Ci2, Co2).
    wrt = jnp.transpose(wr, (2, 3, 0, 1))                            # (K,K,Cin,Cout)
    wit = jnp.transpose(wi, (2, 3, 0, 1))
    top = jnp.concatenate([wrt, wit], axis=-1)                       # real-input rows
    bot = jnp.concatenate([-wit, wrt], axis=-1)                      # imag-input rows
    wblk = jnp.concatenate([top, bot], axis=2)                       # (K,K,Ci2,Co2)

    # Fused, tap-packed weight (4*Co2, 9*Ci2) built by concatenation.
    # Output pixel (2a+py, 2b+px) sums taps (dy,dx) in {0,1}^2 with kernel
    # indices ky = 3-py-2dy, kx = 3-px-2dx over input (a+py+dy-1, b+px+dx-1);
    # its slot in the shared 3x3 shift grid is (sy, sx) = (py+dy, px+dx).
    zeros = jnp.zeros((Co2, Ci2), jnp.float32)

    def phase_rows(py, px):
        blocks = []
        for sy in range(3):
            for sx in range(3):
                dy, dx = sy - py, sx - px
                if 0 <= dy <= 1 and 0 <= dx <= 1:
                    ky, kx = 3 - py - 2 * dy, 3 - px - 2 * dx
                    blocks.append(wblk[ky, kx].T)                    # (Co2, Ci2)
                else:
                    blocks.append(zeros)
        return jnp.concatenate(blocks, axis=1)                       # (Co2, 9*Ci2)

    w_fused = jnp.concatenate(
        [phase_rows(py, px) for py in range(2) for px in range(2)],
        axis=0).astype(jnp.bfloat16)                                 # (4*Co2, 9*Ci2)

    b_blk = jnp.concatenate([br - bi, br + bi]).reshape(Co2, 1).astype(jnp.float32)
    b_fused = jnp.tile(b_blk, (4, 1))                                # (4*Co2, 1)

    kernel = _make_kernel(H, W, Ci2)
    out = pl.pallas_call(
        kernel,
        out_shape=jax.ShapeDtypeStruct((N, 4 * Co2, HW), jnp.float32),
        grid_spec=pltpu.PrefetchScalarGridSpec(
            num_scalar_prefetch=0,
            grid=(N,),                                    # one step per image
            in_specs=[
                pl.BlockSpec((1, Ci2, FLAT), lambda n: (n, 0, 0)),
                pl.BlockSpec((4 * Co2, 9 * Ci2), lambda n: (0, 0)),  # resident
                pl.BlockSpec((4 * Co2, 1), lambda n: (0, 0)),        # resident
            ],
            out_specs=pl.BlockSpec((1, 4 * Co2, HW), lambda n: (n, 0, 0)),
            scratch_shapes=[pltpu.VMEM((9 * Ci2, HW), jnp.bfloat16)],
        ),
        compiler_params=pltpu.CompilerParams(
            dimension_semantics=("parallel",),
            vmem_limit_bytes=32 * 1024 * 1024),
    )(x_flat, w_fused, b_fused)

    # Interleave the 4 phases back into NCHW (layout plumbing; see header TODO).
    out = out.reshape(N, 2, 2, Co2, H, W)                  # (n, py, px, c, a, b)
    out = jnp.transpose(out, (0, 3, 4, 1, 5, 2))           # (n, c, a, py, b, px)
    out = out.reshape(N, Co2, STRIDE * H, STRIDE * W)
    return out[:, :Cout] + 1j * out[:, Cout:]


# ---------------------------------------------------------------------------
# Pure-numpy reference (direct ConvTranspose2d semantics) for verification.
# ---------------------------------------------------------------------------
def _ref_conv_transpose2d(x, w, b):
    # x: (N, Ci, H, W), w: (Ci, Co, K, K), b: (Co,)
    N, Ci, H, W = x.shape
    Co = w.shape[1]
    Ho, Wo = STRIDE * H, STRIDE * W
    out = np.zeros((N, Co, Ho, Wo), np.float64) + b[None, :, None, None]
    for iy in range(H):
        for ix in range(W):
            for ky in range(K):
                for kx in range(K):
                    oy = STRIDE * iy - PAD + ky
                    ox = STRIDE * ix - PAD + kx
                    if 0 <= oy < Ho and 0 <= ox < Wo:
                        out[:, :, oy, ox] += x[:, :, iy, ix] @ w[:, :, ky, kx]
    return out


if __name__ == "__main__":
    N, Cin, Cout, H, W = 2, 4, 4, 16, 16

    key = jax.random.PRNGKey(0)
    k1, k2, k3, k4, k5, k6 = jax.random.split(key, 6)

    xr = jax.random.normal(k1, (N, Cin, H, W), jnp.float32)
    xi = jax.random.normal(k2, (N, Cin, H, W), jnp.float32)
    x = (xr + 1j * xi).astype(jnp.complex64)            # PyTorch-style NCHW complex

    bound = 1.0 / math.sqrt(Cin * K * K)                 # deterministic synthetic init
    wr = jax.random.uniform(k3, (Cin, Cout, K, K), jnp.float32, -bound, bound)
    wi = jax.random.uniform(k4, (Cin, Cout, K, K), jnp.float32, -bound, bound)
    br = jax.random.uniform(k5, (Cout,), jnp.float32, -bound, bound)
    bi = jax.random.uniform(k6, (Cout,), jnp.float32, -bound, bound)

    out = cup2_forward(x, wr, wi, br, bi)
    out = jax.block_until_ready(out)
    assert out.shape == (N, Cout, STRIDE * H, STRIDE * W)
    assert out.dtype == jnp.complex64

    # Verify against direct transposed-conv reference (apply_complex semantics).
    xr_np, xi_np = np.asarray(xr, np.float64), np.asarray(xi, np.float64)
    wr_np, wi_np = np.asarray(wr, np.float64), np.asarray(wi, np.float64)
    br_np, bi_np = np.asarray(br, np.float64), np.asarray(bi, np.float64)
    ref_r = (_ref_conv_transpose2d(xr_np, wr_np, br_np)
             - _ref_conv_transpose2d(xi_np, wi_np, bi_np))
    ref_i = (_ref_conv_transpose2d(xi_np, wr_np, br_np)
             + _ref_conv_transpose2d(xr_np, wi_np, bi_np))

    # bf16 MXU inputs with f32 accumulation -> loosened tolerance vs the f32 v2.
    np.testing.assert_allclose(np.real(out), ref_r, rtol=3e-2, atol=3e-2)
    np.testing.assert_allclose(np.imag(out), ref_i, rtol=3e-2, atol=3e-2)

    print("KERNEL_OK")
</pallas_src>

<mosaic_0001>
module attributes {stable_mosaic.version = 11 : i64} {
  func.func @kernel(%arg0: i32, %arg1: memref<1x8x290xbf16, #tpu.memory_space<vmem>>, %arg2: memref<32x72xbf16, #tpu.memory_space<vmem>>, %arg3: memref<32x1xf32, #tpu.memory_space<vmem>>, %arg4: memref<1x32x256xf32, #tpu.memory_space<vmem>>, %arg5: memref<72x256xbf16, #tpu.memory_space<vmem>>) attributes {dimension_semantics = [#tpu.dimension_semantics<parallel>], iteration_bounds = array<i64: 2>, scalar_prefetch = 0 : i64, scratch_operands = 1 : i64, tpu.core_type = #tpu.core_type<tc>, window_params = [{transform_indices = @transform_0, window_bounds = array<i64: 1, 8, 290>}, {pipeline_mode = #tpu.pipeline_mode<synchronous>, transform_indices = @transform_1, window_bounds = array<i64: 32, 72>}, {pipeline_mode = #tpu.pipeline_mode<synchronous>, transform_indices = @transform_2, window_bounds = array<i64: 32, 1>}, {transform_indices = @transform_3, window_bounds = array<i64: 1, 32, 256>}]} {
    %c0 = arith.constant 0 : index
    %c0_0 = arith.constant 0 : index
    %c0_1 = arith.constant 0 : index
    %0 = vector.load %arg1[%c0, %c0_0, %c0_1] : memref<1x8x290xbf16, #tpu.memory_space<vmem>>, vector<1x8x290xbf16>
    %1 = vector.shape_cast %0 : vector<1x8x290xbf16> to vector<8x290xbf16>
    %2 = tpu.iota {dimensions = array<i32: 1>} : vector<8x256xi32>
    %c16_i32 = arith.constant 16 : i32
    %c0_i32 = arith.constant 0 : i32
    %3 = arith.cmpi eq, %c16_i32, %c0_i32 : i32
    %c1_i32 = arith.constant 1 : i32
    %4 = arith.select %3, %c1_i32, %c16_i32 : i32
    %5 = vector.broadcast %4 : i32 to vector<8x256xi32>
    %6 = arith.remsi %2, %5 : vector<8x256xi32>
    %c0_i32_2 = arith.constant 0 : i32
    %7 = vector.broadcast %c0_i32_2 : i32 to vector<8x256xi32>
    %8 = arith.cmpi ne, %6, %7 : vector<8x256xi32>
    %c0_i32_3 = arith.constant 0 : i32
    %9 = vector.broadcast %c0_i32_3 : i32 to vector<8x256xi32>
    %10 = arith.cmpi slt, %6, %9 : vector<8x256xi32>
    %c0_i32_4 = arith.constant 0 : i32
    %11 = arith.cmpi slt, %4, %c0_i32_4 : i32
    %12 = vector.broadcast %11 : i1 to vector<8x256xi1>
    %13 = vector.broadcast %12 : vector<8x256xi1> to vector<8x256xi1>
    %14 = arith.xori %10, %13 : vector<8x256xi1>
    %15 = arith.andi %14, %8 : vector<8x256xi1>
    %16 = vector.broadcast %4 : i32 to vector<8x256xi32>
    %17 = arith.addi %6, %16 : vector<8x256xi32>
    %18 = arith.select %15, %17, %6 : vector<8x256xi1>, vector<8x256xi32>
    %c1_i32_5 = arith.constant 1 : i32
    %19 = vector.broadcast %c1_i32_5 : i32 to vector<8x256xi32>
    %20 = arith.cmpi sge, %18, %19 : vector<8x256xi32>
    %c14_i32 = arith.constant 14 : i32
    %21 = vector.broadcast %c14_i32 : i32 to vector<8x256xi32>
    %22 = arith.cmpi sle, %18, %21 : vector<8x256xi32>
    %23 = vector.extract_strided_slice %1 {offsets = [0, 0], sizes = [8, 256], strides = [1, 1]} : vector<8x290xbf16> to vector<8x256xbf16>
    %24 = arith.extf %23 : vector<8x256xbf16> to vector<8x256xf32>
    %cst = arith.constant 0.000000e+00 : f32
    %25 = vector.broadcast %cst : f32 to vector<8x256xf32>
    %26 = arith.select %20, %24, %25 : vector<8x256xi1>, vector<8x256xf32>
    %27 = arith.truncf %26 : vector<8x256xf32> to vector<8x256xbf16>
    %c0_6 = arith.constant 0 : index
    %c0_7 = arith.constant 0 : index
    %28 = vector.load %arg5[%c0_6, %c0_7] : memref<72x256xbf16, #tpu.memory_space<vmem>>, vector<8x256xbf16>
    tpu.vector_store %arg5[%c0_6, %c0_7], %27 {strides = array<i32>} : memref<72x256xbf16, #tpu.memory_space<vmem>>, vector<8x256xbf16>,
    %29 = vector.extract_strided_slice %1 {offsets = [0, 1], sizes = [8, 256], strides = [1, 1]} : vector<8x290xbf16> to vector<8x256xbf16>
    %c8 = arith.constant 8 : index
    %c0_8 = arith.constant 0 : index
    %30 = vector.load %arg5[%c8, %c0_8] : memref<72x256xbf16, #tpu.memory_space<vmem>>, vector<8x256xbf16>
    tpu.vector_store %arg5[%c8, %c0_8], %29 {strides = array<i32>} : memref<72x256xbf16, #tpu.memory_space<vmem>>, vector<8x256xbf16>,
    %31 = vector.extract_strided_slice %1 {offsets = [0, 2], sizes = [8, 256], strides = [1, 1]} : vector<8x290xbf16> to vector<8x256xbf16>
    %32 = arith.extf %31 : vector<8x256xbf16> to vector<8x256xf32>
    %cst_9 = arith.constant 0.000000e+00 : f32
    %33 = vector.broadcast %cst_9 : f32 to vector<8x256xf32>
    %34 = arith.select %22, %32, %33 : vector<8x256xi1>, vector<8x256xf32>
    %35 = arith.truncf %34 : vector<8x256xf32> to vector<8x256xbf16>
    %c16 = arith.constant 16 : index
    %c0_10 = arith.constant 0 : index
    %36 = vector.load %arg5[%c16, %c0_10] : memref<72x256xbf16, #tpu.memory_space<vmem>>, vector<8x256xbf16>
    tpu.vector_store %arg5[%c16, %c0_10], %35 {strides = array<i32>} : memref<72x256xbf16, #tpu.memory_space<vmem>>, vector<8x256xbf16>,
    %37 = vector.extract_strided_slice %1 {offsets = [0, 16], sizes = [8, 256], strides = [1, 1]} : vector<8x290xbf16> to vector<8x256xbf16>
    %38 = arith.extf %37 : vector<8x256xbf16> to vector<8x256xf32>
    %cst_11 = arith.constant 0.000000e+00 : f32
    %39 = vector.broadcast %cst_11 : f32 to vector<8x256xf32>
    %40 = arith.select %20, %38, %39 : vector<8x256xi1>, vector<8x256xf32>
    %41 = arith.truncf %40 : vector<8x256xf32> to vector<8x256xbf16>
    %c24 = arith.constant 24 : index
    %c0_12 = arith.constant 0 : index
    %42 = vector.load %arg5[%c24, %c0_12] : memref<72x256xbf16, #tpu.memory_space<vmem>>, vector<8x256xbf16>
    tpu.vector_store %arg5[%c24, %c0_12], %41 {strides = array<i32>} : memref<72x256xbf16, #tpu.memory_space<vmem>>, vector<8x256xbf16>,
    %43 = vector.extract_strided_slice %1 {offsets = [0, 17], sizes = [8, 256], strides = [1, 1]} : vector<8x290xbf16> to vector<8x256xbf16>
    %c32 = arith.constant 32 : index
    %c0_13 = arith.constant 0 : index
    %44 = vector.load %arg5[%c32, %c0_13] : memref<72x256xbf16, #tpu.memory_space<vmem>>, vector<8x256xbf16>
    tpu.vector_store %arg5[%c32, %c0_13], %43 {strides = array<i32>} : memref<72x256xbf16, #tpu.memory_space<vmem>>, vector<8x256xbf16>,
    %45 = vector.extract_strided_slice %1 {offsets = [0, 18], sizes = [8, 256], strides = [1, 1]} : vector<8x290xbf16> to vector<8x256xbf16>
    %46 = arith.extf %45 : vector<8x256xbf16> to vector<8x256xf32>
    %cst_14 = arith.constant 0.000000e+00 : f32
    %47 = vector.broadcast %cst_14 : f32 to vector<8x256xf32>
    %48 = arith.select %22, %46, %47 : vector<8x256xi1>, vector<8x256xf32>
    %49 = arith.truncf %48 : vector<8x256xf32> to vector<8x256xbf16>
    %c40 = arith.constant 40 : index
    %c0_15 = arith.constant 0 : index
    %50 = vector.load %arg5[%c40, %c0_15] : memref<72x256xbf16, #tpu.memory_space<vmem>>, vector<8x256xbf16>
    tpu.vector_store %arg5[%c40, %c0_15], %49 {strides = array<i32>} : memref<72x256xbf16, #tpu.memory_space<vmem>>, vector<8x256xbf16>,
    %51 = vector.extract_strided_slice %1 {offsets = [0, 32], sizes = [8, 256], strides = [1, 1]} : vector<8x290xbf16> to vector<8x256xbf16>
    %52 = arith.extf %51 : vector<8x256xbf16> to vector<8x256xf32>
    %cst_16 = arith.constant 0.000000e+00 : f32
    %53 = vector.broadcast %cst_16 : f32 to vector<8x256xf32>
    %54 = arith.select %20, %52, %53 : vector<8x256xi1>, vector<8x256xf32>
    %55 = arith.truncf %54 : vector<8x256xf32> to vector<8x256xbf16>
    %c48 = arith.constant 48 : index
    %c0_17 = arith.constant 0 : index
    %56 = vector.load %arg5[%c48, %c0_17] : memref<72x256xbf16, #tpu.memory_space<vmem>>, vector<8x256xbf16>
    tpu.vector_store %arg5[%c48, %c0_17], %55 {strides = array<i32>} : memref<72x256xbf16, #tpu.memory_space<vmem>>, vector<8x256xbf16>,
    %57 = vector.extract_strided_slice %1 {offsets = [0, 33], sizes = [8, 256], strides = [1, 1]} : vector<8x290xbf16> to vector<8x256xbf16>
    %c56 = arith.constant 56 : index
    %c0_18 = arith.constant 0 : index
    %58 = vector.load %arg5[%c56, %c0_18] : memref<72x256xbf16, #tpu.memory_space<vmem>>, vector<8x256xbf16>
    tpu.vector_store %arg5[%c56, %c0_18], %57 {strides = array<i32>} : memref<72x256xbf16, #tpu.memory_space<vmem>>, vector<8x256xbf16>,
    %59 = vector.extract_strided_slice %1 {offsets = [0, 34], sizes = [8, 256], strides = [1, 1]} : vector<8x290xbf16> to vector<8x256xbf16>
    %60 = arith.extf %59 : vector<8x256xbf16> to vector<8x256xf32>
    %cst_19 = arith.constant 0.000000e+00 : f32
    %61 = vector.broadcast %cst_19 : f32 to vector<8x256xf32>
    %62 = arith.select %22, %60, %61 : vector<8x256xi1>, vector<8x256xf32>
    %63 = arith.truncf %62 : vector<8x256xf32> to vector<8x256xbf16>
    %c64 = arith.constant 64 : index
    %c0_20 = arith.constant 0 : index
    %64 = vector.load %arg5[%c64, %c0_20] : memref<72x256xbf16, #tpu.memory_space<vmem>>, vector<8x256xbf16>
    tpu.vector_store %arg5[%c64, %c0_20], %63 {strides = array<i32>} : memref<72x256xbf16, #tpu.memory_space<vmem>>, vector<8x256xbf16>,
    %c0_21 = arith.constant 0 : index
    %c0_22 = arith.constant 0 : index
    %65 = vector.load %arg2[%c0_21, %c0_22] : memref<32x72xbf16, #tpu.memory_space<vmem>>, vector<32x72xbf16>
    %c0_23 = arith.constant 0 : index
    %c0_24 = arith.constant 0 : index
    %66 = vector.load %arg5[%c0_23, %c0_24] : memref<72x256xbf16, #tpu.memory_space<vmem>>, vector<72x256xbf16>
    %cst_25 = arith.constant dense<0.000000e+00> : vector<32x256xf32>
    %67 = tpu.matmul %65, %66, %cst_25 {dimension_numbers = #tpu.dot_dimension_numbers<[1], [0], [0], [1], [0, 0, 1, 1], [], []>} : vector<32x72xbf16>, vector<72x256xbf16>, vector<32x256xf32> -> vector<32x256xf32>
    %c0_26 = arith.constant 0 : index
    %c0_27 = arith.constant 0 : index
    %68 = vector.load %arg3[%c0_26, %c0_27] : memref<32x1xf32, #tpu.memory_space<vmem>>, vector<32x1xf32>
    %69 = vector.broadcast %68 : vector<32x1xf32> to vector<32x256xf32>
    %70 = arith.addf %67, %69 : vector<32x256xf32>
    %c0_28 = arith.constant 0 : index
    %c0_29 = arith.constant 0 : index
    %c0_30 = arith.constant 0 : index
    %71 = vector.load %arg4[%c0_28, %c0_29, %c0_30] : memref<1x32x256xf32, #tpu.memory_space<vmem>>, vector<1x32x256xf32>
    %72 = vector.shape_cast %71 : vector<1x32x256xf32> to vector<32x256xf32>
    %73 = vector.shape_cast %70 : vector<32x256xf32> to vector<1x32x256xf32>
    tpu.vector_store %arg4[%c0_28, %c0_29, %c0_30], %73 {strides = array<i32>} : memref<1x32x256xf32, #tpu.memory_space<vmem>>, vector<1x32x256xf32>,
    return
  }
  func.func @transform_0(%arg0: i32) -> (i32, i32, i32) {
    %c0_i32 = arith.constant 0 : i32
    %c0_i32_0 = arith.constant 0 : i32
    %c0_i32_1 = arith.constant 0 : i32
    return %arg0, %c0_i32, %c0_i32_0 : i32, i32, i32
  }
  func.func @transform_1(%arg0: i32) -> (i32, i32) {
    %c0_i32 = arith.constant 0 : i32
    %c0_i32_0 = arith.constant 0 : i32
    %c0_i32_1 = arith.constant 0 : i32
    return %c0_i32, %c0_i32_0 : i32, i32
  }
  func.func @transform_2(%arg0: i32) -> (i32, i32) {
    %c0_i32 = arith.constant 0 : i32
    %c0_i32_0 = arith.constant 0 : i32
    %c0_i32_1 = arith.constant 0 : i32
    return %c0_i32, %c0_i32_0 : i32, i32
  }
  func.func @transform_3(%arg0: i32) -> (i32, i32, i32) {
    %c0_i32 = arith.constant 0 : i32
    %c0_i32_0 = arith.constant 0 : i32
    %c0_i32_1 = arith.constant 0 : i32
    return %arg0, %c0_i32, %c0_i32_0 : i32, i32, i32
  }
}

</mosaic_0001>

<bundles_post_ra>
// kernel: custom-call.1
= control target key start
LH: loop header
LB: loop body
LE: loop exit
PB: predicated region body
PF: predicated region fallthrough
CT: control target
= control target key end

     0   :  { %s59_s0 = inlined_call_operand.hbm [shape: c64[2,4,16,16], index: 0, kind: input, shape index: {}]   ;;  %s60_s1 = inlined_call_operand.vmem [shape: f32[2,4,16,16], index: 1, kind: output, shape index: {}]  }
   0x1   :  { %s2_s8 = scalar_lea.hbm %s59_s0, 2048 }
   0x2   :  { %3 = vsyncpa [#allocation0], 0  ;;  %s4_s11 = sshll.u32 %s60_s1, 4  ;;  %s34_s14 = scalar_lea.hbm %s59_s0, 4096  ;;  %s5_s11 = int_to_ptr.vmem [resolvable:$true] %s4_s11 }
   0x3   :  { %p11_p0 = scmp.ne.s32.totalorder %s2_s8, %s34_s14  ;;  %p13_p1 = scmp.lt.u32.totalorder %s2_s8, %s59_s0 }
   0x4   :  { %p14_p2 = scmp.lt.u32.totalorder %s34_s14, %s34_s14  ;;  %p16_p4 = scmp.lt.u32.totalorder %s34_s14, %s2_s8 }
   0x6   :  { %p15_p3 = por %p14_p2, %p13_p1 }
   0x8   :  { %p17_p5 = por %p16_p4, %p15_p3 }
   0xa   :  { %p18_p6 = pnand %p17_p5, %p11_p0 }
   0xc   :  { %21 = shalt.err (!%p18_p6)  }
   0xd   :  { %s22_s17 = scalar_lea.vmem %s5_s11, 2048  ;;  %p27_p8 = scmp.lt.s32.totalorder %s5_s11, %s5_s11 }
   0xe   :  { %p23_p7 = scmp.ne.s32.totalorder %s5_s11, %s22_s17  ;;  %p28_p9 = scmp.lt.s32.totalorder %s22_s17, %s22_s17 }
  0x10   :  { %p29_p10 = por %p28_p9, %p27_p8 }
  0x12   :  { %p30_p11 = pnand %p29_p10, %p23_p7 }
  0x14   :  { %33 = shalt.err (!%p30_p11)  }
  0x15   :  { %7 = dma.hbm_to_vmem [thread:$0]  %s2_s8, 2048, %s5_s11, [#allocation0] }
  0x16   :  { %35 = dma.done.wait [#allocation0], 2048  }
  0x17   :  { %36 = vsyncadd [#allocation0], 4294965248 }
  0x18   :  { %9 = vsyncpa [#allocation0], 1 }

// kernel: custom-call
= control target key start
LH: loop header
LB: loop body
LE: loop exit
PB: predicated region body
PF: predicated region fallthrough
CT: control target
= control target key end

     0   :  { %2 = vsyncpa [#allocation0], 0  ;;  %s61_s0 = inlined_call_operand.hbm [shape: c64[2,4,16,16], index: 0, kind: input, shape index: {}]   ;;  %s62_s1 = inlined_call_operand.vmem [shape: f32[2,4,16,16], index: 1, kind: output, shape index: {}]  }
   0x1   :  { %s3_s8 = sshll.u32 %s62_s1, 4  ;;  %s9_s11 = scalar_lea.hbm %s61_s0, 2048  ;;  %s4_s8 = int_to_ptr.vmem [resolvable:$true] %s3_s8 }
   0x2   :  { %p10_p0 = scmp.ne.s32.totalorder %s61_s0, %s9_s11  ;;  %s11_s16 = scalar_lea.hbm %s61_s0, 4096 }
   0x3   :  { %p12_p1 = scmp.lt.u32.totalorder %s11_s16, %s9_s11  ;;  %p13_p2 = scmp.lt.u32.totalorder %s9_s11, %s61_s0 }
   0x5   :  { %p14_p3 = por %p13_p2, %p12_p1 }
   0x7   :  { %p15_p4 = pnand %p14_p3, %p10_p0 }
   0x9   :  { %18 = shalt.err (!%p15_p4)  }
   0xa   :  { %s19_s1 = scalar_lea.vmem %s4_s8, 2048  ;;  %p24_p6 = scmp.lt.s32.totalorder %s4_s8, %s4_s8 }
   0xb   :  { %p20_p5 = scmp.ne.s32.totalorder %s4_s8, %s19_s1  ;;  %p25_p7 = scmp.lt.s32.totalorder %s19_s1, %s19_s1 }
   0xd   :  { %p26_p8 = por %p25_p7, %p24_p6 }
   0xf   :  { %p27_p9 = pnand %p26_p8, %p20_p5 }
  0x11   :  { %30 = shalt.err (!%p27_p9)  }
  0x12   :  { %6 = dma.hbm_to_vmem [thread:$0]  %s61_s0, 2048, %s4_s8, [#allocation0] }
  0x13   :  { %31 = dma.done.wait [#allocation0], 2048  }
  0x14   :  { %32 = vsyncadd [#allocation0], 4294965248 }
  0x15   :  { %8 = vsyncpa [#allocation0], 1 }

// kernel: custom-call.2
= control target key start
LH: loop header
LB: loop body
LE: loop exit
PB: predicated region body
PF: predicated region fallthrough
CT: control target
= control target key end

     0   :  { %s6412_s0 = inlined_call_operand.vmem [shape: f32[2,4,32,32], index: 0, kind: input, shape index: {}]   ;;  %s6413_s2 = inlined_call_operand.vmem [shape: c64[2,4,32,32], index: 2, kind: output, shape index: {}]   ;;  %s6414_s1 = inlined_call_operand.vmem [shape: f32[2,4,32,32], index: 1, kind: input, shape index: {}]  }
   0x1   :  { %v5_v0 = vld [vmem:[%s6412_s0] sm:$0xff]  ;;  %v2304_v1 = vld [vmem:[%s6412_s0 + $0x8] sm:$0xff]  ;;  %v2306_v2 = vld [vmem:[%s6412_s0 + $0x10] sm:$0xff] }
   0x2   :  { %6 = vst [vmem:[%s6413_s2] sm:$0xff] %v5_v0  ;;  %2305 = vst [vmem:[%s6413_s2 + $0x8] sm:$0xff] %v2304_v1  ;;  %v2308_v3 = vld [vmem:[%s6412_s0 + $0x18] sm:$0xff]  ;;  %v2310_v4 = vld [vmem:[%s6412_s0 + $0x20] sm:$0xff] }
   0x3   :  { %2307 = vst [vmem:[%s6413_s2 + $0x10] sm:$0xff] %v2306_v2  ;;  %v2312_v5 = vld [vmem:[%s6412_s0 + $0x28] sm:$0xff]  ;;  %2309 = vst [vmem:[%s6413_s2 + $0x18] sm:$0xff] %v2308_v3  ;;  %v2314_v6 = vld [vmem:[%s6412_s0 + $0x30] sm:$0xff] }
   0x4   :  { %2311 = vst [vmem:[%s6413_s2 + $0x20] sm:$0xff] %v2310_v4  ;;  %2313 = vst [vmem:[%s6413_s2 + $0x28] sm:$0xff] %v2312_v5  ;;  %v2316_v7 = vld [vmem:[%s6412_s0 + $0x38] sm:$0xff]  ;;  %v2318_v8 = vld [vmem:[%s6412_s0 + $0x40] sm:$0xff] }
   0x5   :  { %2315 = vst [vmem:[%s6413_s2 + $0x30] sm:$0xff] %v2314_v6  ;;  %2317 = vst [vmem:[%s6413_s2 + $0x38] sm:$0xff] %v2316_v7  ;;  %v2320_v9 = vld [vmem:[%s6412_s0 + $0x48] sm:$0xff]  ;;  %v2322_v10 = vld [vmem:[%s6412_s0 + $0x50] sm:$0xff] }
   0x6   :  { %2319 = vst [vmem:[%s6413_s2 + $0x40] sm:$0xff] %v2318_v8  ;;  %v2324_v11 = vld [vmem:[%s6412_s0 + $0x58] sm:$0xff]  ;;  %2321 = vst [vmem:[%s6413_s2 + $0x48] sm:$0xff] %v2320_v9  ;;  %v2326_v12 = vld [vmem:[%s6412_s0 + $0x60] sm:$0xff] }
   0x7   :  { %2323 = vst [vmem:[%s6413_s2 + $0x50] sm:$0xff] %v2322_v10  ;;  %2325 = vst [vmem:[%s6413_s2 + $0x58] sm:$0xff] %v2324_v11  ;;  %v2328_v13 = vld [vmem:[%s6412_s0 + $0x68] sm:$0xff]  ;;  %v2330_v14 = vld [vmem:[%s6412_s0 + $0x70] sm:$0xff] }
   0x8   :  { %2327 = vst [vmem:[%s6413_s2 + $0x60] sm:$0xff] %v2326_v12  ;;  %2329 = vst [vmem:[%s6413_s2 + $0x68] sm:$0xff] %v2328_v13  ;;  %v2332_v15 = vld [vmem:[%s6412_s0 + $0x78] sm:$0xff]  ;;  %v2334_v16 = vld [vmem:[%s6412_s0 + $0x80] sm:$0xff] }
   0x9   :  { %2331 = vst [vmem:[%s6413_s2 + $0x70] sm:$0xff] %v2330_v14  ;;  %v2336_v17 = vld [vmem:[%s6412_s0 + $0x88] sm:$0xff]  ;;  %2333 = vst [vmem:[%s6413_s2 + $0x78] sm:$0xff] %v2332_v15  ;;  %v2338_v18 = vld [vmem:[%s6412_s0 + $0x90] sm:$0xff] }
   0xa   :  { %2335 = vst [vmem:[%s6413_s2 + $0x80] sm:$0xff] %v2334_v16  ;;  %2337 = vst [vmem:[%s6413_s2 + $0x88] sm:$0xff] %v2336_v17  ;;  %v2340_v19 = vld [vmem:[%s6412_s0 + $0x98] sm:$0xff]  ;;  %v2342_v20 = vld [vmem:[%s6412_s0 + $0xa0] sm:$0xff] }
   0xb   :  { %2339 = vst [vmem:[%s6413_s2 + $0x90] sm:$0xff] %v2338_v18  ;;  %2341 = vst [vmem:[%s6413_s2 + $0x98] sm:$0xff] %v2340_v19  ;;  %v2344_v21 = vld [vmem:[%s6412_s0 + $0xa8] sm:$0xff]  ;;  %v2346_v22 = vld [vmem:[%s6412_s0 + $0xb0] sm:$0xff] }
   0xc   :  { %2343 = vst [vmem:[%s6413_s2 + $0xa0] sm:$0xff] %v2342_v20  ;;  %v2348_v23 = vld [vmem:[%s6412_s0 + $0xb8] sm:$0xff]  ;;  %2345 = vst [vmem:[%s6413_s2 + $0xa8] sm:$0xff] %v2344_v21  ;;  %v2350_v24 = vld [vmem:[%s6412_s0 + $0xc0] sm:$0xff] }
   0xd   :  { %2347 = vst [vmem:[%s6413_s2 + $0xb0] sm:$0xff] %v2346_v22  ;;  %2349 = vst [vmem:[%s6413_s2 + $0xb8] sm:$0xff] %v2348_v23  ;;  %v2352_v25 = vld [vmem:[%s6412_s0 + $0xc8] sm:$0xff]  ;;  %v2354_v26 = vld [vmem:[%s6412_s0 + $0xd0] sm:$0xff] }
   0xe   :  { %2351 = vst [vmem:[%s6413_s2 + $0xc0] sm:$0xff] %v2350_v24  ;;  %2353 = vst [vmem:[%s6413_s2 + $0xc8] sm:$0xff] %v2352_v25  ;;  %v2356_v27 = vld [vmem:[%s6412_s0 + $0xd8] sm:$0xff]  ;;  %v2358_v28 = vld [vmem:[%s6412_s0 + $0xe0] sm:$0xff] }
   0xf   :  { %2355 = vst [vmem:[%s6413_s2 + $0xd0] sm:$0xff] %v2354_v26  ;;  %v2360_v29 = vld [vmem:[%s6412_s0 + $0xe8] sm:$0xff]  ;;  %2357 = vst [vmem:[%s6413_s2 + $0xd8] sm:$0xff] %v2356_v27  ;;  %v2362_v30 = vld [vmem:[%s6412_s0 + $0xf0] sm:$0xff] }
  0x10   :  { %2359 = vst [vmem:[%s6413_s2 + $0xe0] sm:$0xff] %v2358_v28  ;;  %2361 = vst [vmem:[%s6413_s2 + $0xe8] sm:$0xff] %v2360_v29  ;;  %v2364_v31 = vld [vmem:[%s6412_s0 + $0xf8] sm:$0xff]  ;;  %v2366_v32 = vld [vmem:[%s6412_s0 + $0x100] sm:$0xff] }
  0x11   :  { %2363 = vst [vmem:[%s6413_s2 + $0xf0] sm:$0xff] %v2362_v30  ;;  %2365 = vst [vmem:[%s6413_s2 + $0xf8] sm:$0xff] %v2364_v31  ;;  %v2368_v33 = vld [vmem:[%s6412_s0 + $0x108] sm:$0xff]  ;;  %v2370_v34 = vld [vmem:[%s6412_s0 + $0x110] sm:$0xff] }
  0x12   :  { %2367 = vst [vmem:[%s6413_s2 + $0x100] sm:$0xff] %v2366_v32  ;;  %v2372_v35 = vld [vmem:[%s6412_s0 + $0x118] sm:$0xff]  ;;  %2369 = vst [vmem:[%s6413_s2 + $0x108] sm:$0xff] %v2368_v33  ;;  %v2374_v36 = vld [vmem:[%s6412_s0 + $0x120] sm:$0xff] }
  0x13   :  { %2371 = vst [vmem:[%s6413_s2 + $0x110] sm:$0xff] %v2370_v34  ;;  %2373 = vst [vmem:[%s6413_s2 + $0x118] sm:$0xff] %v2372_v35  ;;  %v2376_v37 = vld [vmem:[%s6412_s0 + $0x128] sm:$0xff]  ;;  %v2378_v38 = vld [vmem:[%s6412_s0 + $0x130] sm:$0xff] }
  0x14   :  { %2375 = vst [vmem:[%s6413_s2 + $0x120] sm:$0xff] %v2374_v36  ;;  %2377 = vst [vmem:[%s6413_s2 + $0x128] sm:$0xff] %v2376_v37  ;;  %v2380_v39 = vld [vmem:[%s6412_s0 + $0x138] sm:$0xff]  ;;  %v2382_v40 = vld [vmem:[%s6412_s0 + $0x140] sm:$0xff] }
  0x15   :  { %2379 = vst [vmem:[%s6413_s2 + $0x130] sm:$0xff] %v2378_v38  ;;  %v2384_v41 = vld [vmem:[%s6412_s0 + $0x148] sm:$0xff]  ;;  %2381 = vst [vmem:[%s6413_s2 + $0x138] sm:$0xff] %v2380_v39  ;;  %v2386_v42 = vld [vmem:[%s6412_s0 + $0x150] sm:$0xff] }
  0x16   :  { %2383 = vst [vmem:[%s6413_s2 + $0x140] sm:$0xff] %v2382_v40  ;;  %2385 = vst [vmem:[%s6413_s2 + $0x148] sm:$0xff] %v2384_v41  ;;  %v2388_v43 = vld [vmem:[%s6412_s0 + $0x158] sm:$0xff]  ;;  %v2390_v44 = vld [vmem:[%s6412_s0 + $0x160] sm:$0xff] }
  0x17   :  { %2387 = vst [vmem:[%s6413_s2 + $0x150] sm:$0xff] %v2386_v42  ;;  %2389 = vst [vmem:[%s6413_s2 + $0x158] sm:$0xff] %v2388_v43  ;;  %v2392_v45 = vld [vmem:[%s6412_s0 + $0x168] sm:$0xff]  ;;  %v2394_v46 = vld [vmem:[%s6412_s0 + $0x170] sm:$0xff] }
  0x18   :  { %2391 = vst [vmem:[%s6413_s2 + $0x160] sm:$0xff] %v2390_v44  ;;  %v2396_v47 = vld [vmem:[%s6412_s0 + $0x178] sm:$0xff]  ;;  %2393 = vst [vmem:[%s6413_s2 + $0x168] sm:$0xff] %v2392_v45  ;;  %v2398_v48 = vld [vmem:[%s6412_s0 + $0x180] sm:$0xff] }
  0x19   :  { %2395 = vst [vmem:[%s6413_s2 + $0x170] sm:$0xff] %v2394_v46  ;;  %2397 = vst [vmem:[%s6413_s2 + $0x178] sm:$0xff] %v2396_v47  ;;  %v2400_v49 = vld [vmem:[%s6412_s0 + $0x188] sm:$0xff]  ;;  %v2402_v50 = vld [vmem:[%s6412_s0 + $0x190] sm:$0xff] }
  0x1a   :  { %2399 = vst [vmem:[%s6413_s2 + $0x180] sm:$0xff] %v2398_v48  ;;  %2401 = vst [vmem:[%s6413_s2 + $0x188] sm:$0xff] %v2400_v49  ;;  %v2404_v51 = vld [vmem:[%s6412_s0 + $0x198] sm:$0xff]  ;;  %v2406_v52 = vld [vmem:[%s6412_s0 + $0x1a0] sm:$0xff] }
  0x1b   :  { %2403 = vst [vmem:[%s6413_s2 + $0x190] sm:$0xff] %v2402_v50  ;;  %v2408_v53 = vld [vmem:[%s6412_s0 + $0x1a8] sm:$0xff]  ;;  %2405 = vst [vmem:[%s6413_s2 + $0x198] sm:$0xff] %v2404_v51  ;;  %v2410_v54 = vld [vmem:[%s6412_s0 + $0x1b0] sm:$0xff] }
  0x1c   :  { %2407 = vst [vmem:[%s6413_s2 + $0x1a0] sm:$0xff] %v2406_v52  ;;  %2409 = vst [vmem:[%s6413_s2 + $0x1a8] sm:$0xff] %v2408_v53  ;;  %v2412_v55 = vld [vmem:[%s6412_s0 + $0x1b8] sm:$0xff]  ;;  %v2414_v56 = vld [vmem:[%s6412_s0 + $0x1c0] sm:$0xff] }
  0x1d   :  { %2411 = vst [vmem:[%s6413_s2 + $0x1b0] sm:$0xff] %v2410_v54  ;;  %2413 = vst [vmem:[%s6413_s2 + $0x1b8] sm:$0xff] %v2412_v55  ;;  %v2416_v57 = vld [vmem:[%s6412_s0 + $0x1c8] sm:$0xff]  ;;  %v2418_v58 = vld [vmem:[%s6412_s0 + $0x1d0] sm:$0xff] }
  0x1e   :  { %2415 = vst [vmem:[%s6413_s2 + $0x1c0] sm:$0xff] %v2414_v56  ;;  %v2420_v59 = vld [vmem:[%s6412_s0 + $0x1d8] sm:$0xff]  ;;  %2417 = vst [vmem:[%s6413_s2 + $0x1c8] sm:$0xff] %v2416_v57  ;;  %v2422_v60 = vld [vmem:[%s6412_s0 + $0x1e0] sm:$0xff] }
  0x1f   :  { %2419 = vst [vmem:[%s6413_s2 + $0x1d0] sm:$0xff] %v2418_v58  ;;  %2421 = vst [vmem:[%s6413_s2 + $0x1d8] sm:$0xff] %v2420_v59  ;;  %v2424_v61 = vld [vmem:[%s6412_s0 + $0x1e8] sm:$0xff]  ;;  %v2426_v62 = vld [vmem:[%s6412_s0 + $0x1f0] sm:$0xff] }
  0x20   :  { %2423 = vst [vmem:[%s6413_s2 + $0x1e0] sm:$0xff] %v2422_v60  ;;  %2425 = vst [vmem:[%s6413_s2 + $0x1e8] sm:$0xff] %v2424_v61  ;;  %v2428_v63 = vld [vmem:[%s6412_s0 + $0x1f8] sm:$0xff]  ;;  %v2430_v0 = vld [vmem:[%s6412_s0 + $0x200] sm:$0xff] }
  0x21   :  { %2427 = vst [vmem:[%s6413_s2 + $0x1f0] sm:$0xff] %v2426_v62  ;;  %v2432_v1 = vld [vmem:[%s6412_s0 + $0x208] sm:$0xff]  ;;  %2429 = vst [vmem:[%s6413_s2 + $0x1f8] sm:$0xff] %v2428_v63  ;;  %v2434_v2 = vld [vmem:[%s6412_s0 + $0x210] sm:$0xff] }
  0x22   :  { %2431 = vst [vmem:[%s6413_s2 + $0x200] sm:$0xff] %v2430_v0  ;;  %2433 = vst [vmem:[%s6413_s2 + $0x208] sm:$0xff] %v2432_v1  ;;  %v2436_v3 = vld [vmem:[%s6412_s0 + $0x218] sm:$0xff]  ;;  %v2438_v4 = vld [vmem:[%s6412_s0 + $0x220] sm:$0xff] }
  0x23   :  { %2435 = vst [vmem:[%s6413_s2 + $0x210] sm:$0xff] %v2434_v2  ;;  %2437 = vst [vmem:[%s6413_s2 + $0x218] sm:$0xff] %v2436_v3  ;;  %v2440_v5 = vld [vmem:[%s6412_s0 + $0x228] sm:$0xff]  ;;  %v2442_v6 = vld [vmem:[%s6412_s0 + $0x230] sm:$0xff] }
  0x24   :  { %2439 = vst [vmem:[%s6413_s2 + $0x220] sm:$0xff] %v2438_v4  ;;  %v2444_v7 = vld [vmem:[%s6412_s0 + $0x238] sm:$0xff]  ;;  %2441 = vst [vmem:[%s6413_s2 + $0x228] sm:$0xff] %v2440_v5  ;;  %v2446_v8 = vld [vmem:[%s6412_s0 + $0x240] sm:$0xff] }
  0x25   :  { %2443 = vst [vmem:[%s6413_s2 + $0x230] sm:$0xff] %v2442_v6  ;;  %2445 = vst [vmem:[%s6413_s2 + $0x238] sm:$0xff] %v2444_v7  ;;  %v2448_v9 = vld [vmem:[%s6412_s0 + $0x248] sm:$0xff]  ;;  %v2450_v10 = vld [vmem:[%s6412_s0 + $0x250] sm:$0xff] }
  0x26   :  { %2447 = vst [vmem:[%s6413_s2 + $0x240] sm:$0xff] %v2446_v8  ;;  %2449 = vst [vmem:[%s6413_s2 + $0x248] sm:$0xff] %v2448_v9  ;;  %v2452_v11 = vld [vmem:[%s6412_s0 + $0x258] sm:$0xff]  ;;  %v2454_v12 = vld [vmem:[%s6412_s0 + $0x260] sm:$0xff] }
  0x27   :  { %2451 = vst [vmem:[%s6413_s2 + $0x250] sm:$0xff] %v2450_v10  ;;  %v2456_v13 = vld [vmem:[%s6412_s0 + $0x268] sm:$0xff]  ;;  %2453 = vst [vmem:[%s6413_s2 + $0x258] sm:$0xff] %v2452_v11  ;;  %v2458_v14 = vld [vmem:[%s6412_s0 + $0x270] sm:$0xff] }
  0x28   :  { %2455 = vst [vmem:[%s6413_s2 + $0x260] sm:$0xff] %v2454_v12  ;;  %2457 = vst [vmem:[%s6413_s2 + $0x268] sm:$0xff] %v2456_v13  ;;  %v2460_v15 = vld [vmem:[%s6412_s0 + $0x278] sm:$0xff]  ;;  %v2462_v16 = vld [vmem:[%s6412_s0 + $0x280] sm:$0xff] }
  0x29   :  { %2459 = vst [vmem:[%s6413_s2 + $0x270] sm:$0xff] %v2458_v14  ;;  %2461 = vst [vmem:[%s6413_s2 + $0x278] sm:$0xff] %v2460_v15  ;;  %v2464_v17 = vld [vmem:[%s6412_s0 + $0x288] sm:$0xff]  ;;  %v2466_v18 = vld [vmem:[%s6412_s0 + $0x290] sm:$0xff] }
  0x2a   :  { %2463 = vst [vmem:[%s6413_s2 + $0x280] sm:$0xff] %v2462_v16  ;;  %v2468_v19 = vld [vmem:[%s6412_s0 + $0x298] sm:$0xff]  ;;  %2465 = vst [vmem:[%s6413_s2 + $0x288] sm:$0xff] %v2464_v17  ;;  %v2470_v20 = vld [vmem:[%s6412_s0 + $0x2a0] sm:$0xff] }
  0x2b   :  { %2467 = vst [vmem:[%s6413_s2 + $0x290] sm:$0xff] %v2466_v18  ;;  %2469 = vst [vmem:[%s6413_s2 + $0x298] sm:$0xff] %v2468_v19  ;;  %v2472_v21 = vld [vmem:[%s6412_s0 + $0x2a8] sm:$0xff]  ;;  %v2474_v22 = vld [vmem:[%s6412_s0 + $0x2b0] sm:$0xff] }
  0x2c   :  { %2471 = vst [vmem:[%s6413_s2 + $0x2a0] sm:$0xff] %v2470_v20  ;;  %2473 = vst [vmem:[%s6413_s2 + $0x2a8] sm:$0xff] %v2472_v21  ;;  %v2476_v23 = vld [vmem:[%s6412_s0 + $0x2b8] sm:$0xff]  ;;  %v2478_v24 = vld [vmem:[%s6412_s0 + $0x2c0] sm:$0xff] }
  0x2d   :  { %2475 = vst [vmem:[%s6413_s2 + $0x2b0] sm:$0xff] %v2474_v22  ;;  %v2480_v25 = vld [vmem:[%s6412_s0 + $0x2c8] sm:$0xff]  ;;  %2477 = vst [vmem:[%s6413_s2 + $0x2b8] sm:$0xff] %v2476_v23  ;;  %v2482_v26 = vld [vmem:[%s6412_s0 + $0x2d0] sm:$0xff] }
  0x2e   :  { %2479 = vst [vmem:[%s6413_s2 + $0x2c0] sm:$0xff] %v2478_v24  ;;  %2481 = vst [vmem:[%s6413_s2 + $0x2c8] sm:$0xff] %v2480_v25  ;;  %v2484_v27 = vld [vmem:[%s6412_s0 + $0x2d8] sm:$0xff]  ;;  %v2486_v28 = vld [vmem:[%s6412_s0 + $0x2e0] sm:$0xff] }
  0x2f   :  { %2483 = vst [vmem:[%s6413_s2 + $0x2d0] sm:$0xff] %v2482_v26  ;;  %2485 = vst [vmem:[%s6413_s2 + $0x2d8] sm:$0xff] %v2484_v27  ;;  %v2488_v29 = vld [vmem:[%s6412_s0 + $0x2e8] sm:$0xff]  ;;  %v2490_v30 = vld [vmem:[%s6412_s0 + $0x2f0] sm:$0xff] }
  0x30   :  { %2487 = vst [vmem:[%s6413_s2 + $0x2e0] sm:$0xff] %v2486_v28  ;;  %v2492_v31 = vld [vmem:[%s6412_s0 + $0x2f8] sm:$0xff]  ;;  %2489 = vst [vmem:[%s6413_s2 + $0x2e8] sm:$0xff] %v2488_v29  ;;  %v2494_v32 = vld [vmem:[%s6412_s0 + $0x300] sm:$0xff] }
  0x31   :  { %2491 = vst [vmem:[%s6413_s2 + $0x2f0] sm:$0xff] %v2490_v30  ;;  %2493 = vst [vmem:[%s6413_s2 + $0x2f8] sm:$0xff] %v2492_v31  ;;  %v2496_v33 = vld [vmem:[%s6412_s0 + $0x308] sm:$0xff]  ;;  %v2498_v34 = vld [vmem:[%s6412_s0 + $0x310] sm:$0xff] }
  0x32   :  { %2495 = vst [vmem:[%s6413_s2 + $0x300] sm:$0xff] %v2494_v32  ;;  %2497 = vst [vmem:[%s6413_s2 + $0x308] sm:$0xff] %v2496_v33  ;;  %v2500_v35 = vld [vmem:[%s6412_s0 + $0x318] sm:$0xff]  ;;  %v2502_v36 = vld [vmem:[%s6412_s0 + $0x320] sm:$0xff] }
  0x33   :  { %2499 = vst [vmem:[%s6413_s2 + $0x310] sm:$0xff] %v2498_v34  ;;  %v2504_v37 = vld [vmem:[%s6412_s0 + $0x328] sm:$0xff]  ;;  %2501 = vst [vmem:[%s6413_s2 + $0x318] sm:$0xff] %v2500_v35  ;;  %v2506_v38 = vld [vmem:[%s6412_s0 + $0x330] sm:$0xff] }
  0x34   :  { %2503 = vst [vmem:[%s6413_s2 + $0x320] sm:$0xff] %v2502_v36  ;;  %2505 = vst [vmem:[%s6413_s2 + $0x328] sm:$0xff] %v2504_v37  ;;  %v2508_v39 = vld [vmem:[%s6412_s0 + $0x338] sm:$0xff]  ;;  %v2510_v40 = vld [vmem:[%s6412_s0 + $0x340] sm:$0xff] }
  0x35   :  { %2507 = vst [vmem:[%s6413_s2 + $0x330] sm:$0xff] %v2506_v38  ;;  %2509 = vst [vmem:[%s6413_s2 + $0x338] sm:$0xff] %v2508_v39  ;;  %v2512_v41 = vld [vmem:[%s6412_s0 + $0x348] sm:$0xff]  ;;  %v2514_v42 = vld [vmem:[%s6412_s0 + $0x350] sm:$0xff] }
  0x36   :  { %2511 = vst [vmem:[%s6413_s2 + $0x340] sm:$0xff] %v2510_v40  ;;  %v2516_v43 = vld [vmem:[%s6412_s0 + $0x358] sm:$0xff]  ;;  %2513 = vst [vmem:[%s6413_s2 + $0x348] sm:$0xff] %v2512_v41  ;;  %v2518_v44 = vld [vmem:[%s6412_s0 + $0x360] sm:$0xff] }
  0x37   :  { %2515 = vst [vmem:[%s6413_s2 + $0x350] sm:$0xff] %v2514_v42  ;;  %2517 = vst [vmem:[%s6413_s2 + $0x358] sm:$0xff] %v2516_v43  ;;  %v2520_v45 = vld [vmem:[%s6412_s0 + $0x368] sm:$0xff]  ;;  %v2522_v46 = vld [vmem:[%s6412_s0 + $0x370] sm:$0xff] }
  0x38   :  { %2519 = vst [vmem:[%s6413_s2 + $0x360] sm:$0xff] %v2518_v44  ;;  %2521 = vst [vmem:[%s6413_s2 + $0x368] sm:$0xff] %v2520_v45  ;;  %v2524_v47 = vld [vmem:[%s6412_s0 + $0x378] sm:$0xff]  ;;  %v2526_v48 = vld [vmem:[%s6412_s0 + $0x380] sm:$0xff] }
  0x39   :  { %2523 = vst [vmem:[%s6413_s2 + $0x370] sm:$0xff] %v2522_v46  ;;  %v2528_v49 = vld [vmem:[%s6412_s0 + $0x388] sm:$0xff]  ;;  %2525 = vst [vmem:[%s6413_s2 + $0x378] sm:$0xff] %v2524_v47  ;;  %v2530_v50 = vld [vmem:[%s6412_s0 + $0x390] sm:$0xff] }
  0x3a   :  { %2527 = vst [vmem:[%s6413_s2 + $0x380] sm:$0xff] %v2526_v48  ;;  %2529 = vst [vmem:[%s6413_s2 + $0x388] sm:$0xff] %v2528_v49  ;;  %v2532_v51 = vld [vmem:[%s6412_s0 + $0x398] sm:$0xff]  ;;  %v2534_v52 = vld [vmem:[%s6412_s0 + $0x3a0] sm:$0xff] }
  0x3b   :  { %2531 = vst [vmem:[%s6413_s2 + $0x390] sm:$0xff] %v2530_v50  ;;  %2533 = vst [vmem:[%s6413_s2 + $0x398] sm:$0xff] %v2532_v51  ;;  %v2536_v53 = vld [vmem:[%s6412_s0 + $0x3a8] sm:$0xff]  ;;  %v2538_v54 = vld [vmem:[%s6412_s0 + $0x3b0] sm:$0xff] }
  0x3c   :  { %2535 = vst [vmem:[%s6413_s2 + $0x3a0] sm:$0xff] %v2534_v52  ;;  %v2540_v55 = vld [vmem:[%s6412_s0 + $0x3b8] sm:$0xff]  ;;  %2537 = vst [vmem:[%s6413_s2 + $0x3a8] sm:$0xff] %v2536_v53  ;;  %v2542_v56 = vld [vmem:[%s6412_s0 + $0x3c0] sm:$0xff] }
  0x3d   :  { %2539 = vst [vmem:[%s6413_s2 + $0x3b0] sm:$0xff] %v2538_v54  ;;  %2541 = vst [vmem:[%s6413_s2 + $0x3b8] sm:$0xff] %v2540_v55  ;;  %v2544_v57 = vld [vmem:[%s6412_s0 + $0x3c8] sm:$0xff]  ;;  %v2546_v58 = vld [vmem:[%s6412_s0 + $0x3d0] sm:$0xff] }
  0x3e   :  { %2543 = vst [vmem:[%s6413_s2 + $0x3c0] sm:$0xff] %v2542_v56  ;;  %2545 = vst [vmem:[%s6413_s2 + $0x3c8] sm:$0xff] %v2544_v57  ;;  %v2548_v59 = vld [vmem:[%s6412_s0 + $0x3d8] sm:$0xff]  ;;  %v2550_v60 = vld [vmem:[%s6412_s0 + $0x3e0] sm:$0xff] }
  0x3f   :  { %2547 = vst [vmem:[%s6413_s2 + $0x3d0] sm:$0xff] %v2546_v58  ;;  %v2552_v61 = vld [vmem:[%s6412_s0 + $0x3e8] sm:$0xff]  ;;  %2549 = vst [vmem:[%s6413_s2 + $0x3d8] sm:$0xff] %v2548_v59  ;;  %v2554_v62 = vld [vmem:[%s6412_s0 + $0x3f0] sm:$0xff] }
  0x40   :  { %2551 = vst [vmem:[%s6413_s2 + $0x3e0] sm:$0xff] %v2550_v60  ;;  %2553 = vst [vmem:[%s6413_s2 + $0x3e8] sm:$0xff] %v2552_v61  ;;  %v2556_v63 = vld [vmem:[%s6412_s0 + $0x3f8] sm:$0xff]  ;;  %v2558_v0 = vld [vmem:[%s6412_s0 + $0x400] sm:$0xff] }
  0x41   :  { %2555 = vst [vmem:[%s6413_s2 + $0x3f0] sm:$0xff] %v2554_v62  ;;  %2557 = vst [vmem:[%s6413_s2 + $0x3f8] sm:$0xff] %v2556_v63  ;;  %v2560_v1 = vld [vmem:[%s6412_s0 + $0x408] sm:$0xff]  ;;  %v2562_v2 = vld [vmem:[%s6412_s0 + $0x410] sm:$0xff] }
  0x42   :  { %2559 = vst [vmem:[%s6413_s2 + $0x400] sm:$0xff] %v2558_v0  ;;  %v2564_v3 = vld [vmem:[%s6412_s0 + $0x418] sm:$0xff]  ;;  %2561 = vst [vmem:[%s6413_s2 + $0x408] sm:$0xff] %v2560_v1  ;;  %v2566_v4 = vld [vmem:[%s6412_s0 + $0x420] sm:$0xff] }
  0x43   :  { %2563 = vst [vmem:[%s6413_s2 + $0x410] sm:$0xff] %v2562_v2  ;;  %2565 = vst [vmem:[%s6413_s2 + $0x418] sm:$0xff] %v2564_v3  ;;  %v2568_v5 = vld [vmem:[%s6412_s0 + $0x428] sm:$0xff]  ;;  %v2570_v6 = vld [vmem:[%s6412_s0 + $0x430] sm:$0xff] }
  0x44   :  { %2567 = vst [vmem:[%s6413_s2 + $0x420] sm:$0xff] %v2566_v4  ;;  %2569 = vst [vmem:[%s6413_s2 + $0x428] sm:$0xff] %v2568_v5  ;;  %v2572_v7 = vld [vmem:[%s6412_s0 + $0x438] sm:$0xff]  ;;  %v2574_v8 = vld [vmem:[%s6412_s0 + $0x440] sm:$0xff] }
  0x45   :  { %2571 = vst [vmem:[%s6413_s2 + $0x430] sm:$0xff] %v2570_v6  ;;  %v2576_v9 = vld [vmem:[%s6412_s0 + $0x448] sm:$0xff]  ;;  %2573 = vst [vmem:[%s6413_s2 + $0x438] sm:$0xff] %v2572_v7  ;;  %v2578_v10 = vld [vmem:[%s6412_s0 + $0x450] sm:$0xff] }
  0x46   :  { %2575 = vst [vmem:[%s6413_s2 + $0x440] sm:$0xff] %v2574_v8  ;;  %2577 = vst [vmem:[%s6413_s2 + $0x448] sm:$0xff] %v2576_v9  ;;  %v2580_v11 = vld [vmem:[%s6412_s0 + $0x458] sm:$0xff]  ;;  %v2582_v12 = vld [vmem:[%s6412_s0 + $0x460] sm:$0xff] }
  0x47   :  { %2579 = vst [vmem:[%s6413_s2 + $0x450] sm:$0xff] %v2578_v10  ;;  %2581 = vst [vmem:[%s6413_s2 + $0x458] sm:$0xff] %v2580_v11  ;;  %v2584_v13 = vld [vmem:[%s6412_s0 + $0x468] sm:$0xff]  ;;  %v2586_v14 = vld [vmem:[%s6412_s0 + $0x470] sm:$0xff] }
  0x48   :  { %2583 = vst [vmem:[%s6413_s2 + $0x460] sm:$0xff] %v2582_v12  ;;  %v2588_v15 = vld [vmem:[%s6412_s0 + $0x478] sm:$0xff]  ;;  %2585 = vst [vmem:[%s6413_s2 + $0x468] sm:$0xff] %v2584_v13  ;;  %v2590_v16 = vld [vmem:[%s6412_s0 + $0x480] sm:$0xff] }
  0x49   :  { %2587 = vst [vmem:[%s6413_s2 + $0x470] sm:$0xff] %v2586_v14  ;;  %2589 = vst [vmem:[%s6413_s2 + $0x478] sm:$0xff] %v2588_v15  ;;  %v2592_v17 = vld [vmem:[%s6412_s0 + $0x488] sm:$0xff]  ;;  %v2594_v18 = vld [vmem:[%s6412_s0 + $0x490] sm:$0xff] }
  0x4a   :  { %2591 = vst [vmem:[%s6413_s2 + $0x480] sm:$0xff] %v2590_v16  ;;  %2593 = vst [vmem:[%s6413_s2 + $0x488] sm:$0xff] %v2592_v17  ;;  %v2596_v19 = vld [vmem:[%s6412_s0 + $0x498] sm:$0xff]  ;;  %v2598_v20 = vld [vmem:[%s6412_s0 + $0x4a0] sm:$0xff] }
  0x4b   :  { %2595 = vst [vmem:[%s6413_s2 + $0x490] sm:$0xff] %v2594_v18  ;;  %v2600_v21 = vld [vmem:[%s6412_s0 + $0x4a8] sm:$0xff]  ;;  %2597 = vst [vmem:[%s6413_s2 + $0x498] sm:$0xff] %v2596_v19  ;;  %v2602_v22 = vld [vmem:[%s6412_s0 + $0x4b0] sm:$0xff] }
  0x4c   :  { %2599 = vst [vmem:[%s6413_s2 + $0x4a0] sm:$0xff] %v2598_v20  ;;  %2601 = vst [vmem:[%s6413_s2 + $0x4a8] sm:$0xff] %v2600_v21  ;;  %v2604_v23 = vld [vmem:[%s6412_s0 + $0x4b8] sm:$0xff]  ;;  %v2606_v24 = vld [vmem:[%s6412_s0 + $0x4c0] sm:$0xff] }
  0x4d   :  { %2603 = vst [vmem:[%s6413_s2 + $0x4b0] sm:$0xff] %v2602_v22  ;;  %2605 = vst [vmem:[%s6413_s2 + $0x4b8] sm:$0xff] %v2604_v23  ;;  %v2608_v25 = vld [vmem:[%s6412_s0 + $0x4c8] sm:$0xff]  ;;  %v2610_v26 = vld [vmem:[%s6412_s0 + $0x4d0] sm:$0xff] }
  0x4e   :  { %2607 = vst [vmem:[%s6413_s2 + $0x4c0] sm:$0xff] %v2606_v24  ;;  %v2612_v27 = vld [vmem:[%s6412_s0 + $0x4d8] sm:$0xff]  ;;  %2609 = vst [vmem:[%s6413_s2 + $0x4c8] sm:$0xff] %v2608_v25  ;;  %v2614_v28 = vld [vmem:[%s6412_s0 + $0x4e0] sm:$0xff] }
  0x4f   :  { %2611 = vst [vmem:[%s6413_s2 + $0x4d0] sm:$0xff] %v2610_v26  ;;  %2613 = vst [vmem:[%s6413_s2 + $0x4d8] sm:$0xff] %v2612_v27  ;;  %v2616_v29 = vld [vmem:[%s6412_s0 + $0x4e8] sm:$0xff]  ;;  %v2618_v30 = vld [vmem:[%s6412_s0 + $0x4f0] sm:$0xff] }
  0x50   :  { %2615 = vst [vmem:[%s6413_s2 + $0x4e0] sm:$0xff] %v2614_v28  ;;  %2617 = vst [vmem:[%s6413_s2 + $0x4e8] sm:$0xff] %v2616_v29  ;;  %v2620_v31 = vld [vmem:[%s6412_s0 + $0x4f8] sm:$0xff]  ;;  %v2622_v32 = vld [vmem:[%s6412_s0 + $0x500] sm:$0xff] }
  0x51   :  { %2619 = vst [vmem:[%s6413_s2 + $0x4f0] sm:$0xff] %v2618_v30  ;;  %v2624_v33 = vld [vmem:[%s6412_s0 + $0x508] sm:$0xff]  ;;  %2621 = vst [vmem:[%s6413_s2 + $0x4f8] sm:$0xff] %v2620_v31  ;;  %v2626_v34 = vld [vmem:[%s6412_s0 + $0x510] sm:$0xff] }
  0x52   :  { %2623 = vst [vmem:[%s6413_s2 + $0x500] sm:$0xff] %v2622_v32  ;;  %2625 = vst [vmem:[%s6413_s2 + $0x508] sm:$0xff] %v2624_v33  ;;  %v2628_v35 = vld [vmem:[%s6412_s0 + $0x518] sm:$0xff]  ;;  %v2630_v36 = vld [vmem:[%s6412_s0 + $0x520] sm:$0xff] }
  0x53   :  { %2627 = vst [vmem:[%s6413_s2 + $0x510] sm:$0xff] %v2626_v34  ;;  %2629 = vst [vmem:[%s6413_s2 + $0x518] sm:$0xff] %v2628_v35  ;;  %v2632_v37 = vld [vmem:[%s6412_s0 + $0x528] sm:$0xff]  ;;  %v2634_v38 = vld [vmem:[%s6412_s0 + $0x530] sm:$0xff] }
  0x54   :  { %2631 = vst [vmem:[%s6413_s2 + $0x520] sm:$0xff] %v2630_v36  ;;  %v2636_v39 = vld [vmem:[%s6412_s0 + $0x538] sm:$0xff]  ;;  %2633 = vst [vmem:[%s6413_s2 + $0x528] sm:$0xff] %v2632_v37  ;;  %v2638_v40 = vld [vmem:[%s6412_s0 + $0x540] sm:$0xff] }
  0x55   :  { %2635 = vst [vmem:[%s6413_s2 + $0x530] sm:$0xff] %v2634_v38  ;;  %2637 = vst [vmem:[%s6413_s2 + $0x538] sm:$0xff] %v2636_v39  ;;  %v2640_v41 = vld [vmem:[%s6412_s0 + $0x548] sm:$0xff]  ;;  %v2642_v42 = vld [vmem:[%s6412_s0 + $0x550] sm:$0xff] }
  0x56   :  { %2639 = vst [vmem:[%s6413_s2 + $0x540] sm:$0xff] %v2638_v40  ;;  %2641 = vst [vmem:[%s6413_s2 + $0x548] sm:$0xff] %v2640_v41  ;;  %v2644_v43 = vld [vmem:[%s6412_s0 + $0x558] sm:$0xff]  ;;  %v2646_v44 = vld [vmem:[%s6412_s0 + $0x560] sm:$0xff] }
  0x57   :  { %2643 = vst [vmem:[%s6413_s2 + $0x550] sm:$0xff] %v2642_v42  ;;  %v2648_v45 = vld [vmem:[%s6412_s0 + $0x568] sm:$0xff]  ;;  %2645 = vst [vmem:[%s6413_s2 + $0x558] sm:$0xff] %v2644_v43  ;;  %v2650_v46 = vld [vmem:[%s6412_s0 + $0x570] sm:$0xff] }
  0x58   :  { %2647 = vst [vmem:[%s6413_s2 + $0x560] sm:$0xff] %v2646_v44  ;;  %2649 = vst [vmem:[%s6413_s2 + $0x568] sm:$0xff] %v2648_v45  ;;  %v2652_v47 = vld [vmem:[%s6412_s0 + $0x578] sm:$0xff]  ;;  %v2654_v48 = vld [vmem:[%s6412_s0 + $0x580] sm:$0xff] }
  0x59   :  { %2651 = vst [vmem:[%s6413_s2 + $0x570] sm:$0xff] %v2650_v46  ;;  %2653 = vst [vmem:[%s6413_s2 + $0x578] sm:$0xff] %v2652_v47  ;;  %v2656_v49 = vld [vmem:[%s6412_s0 + $0x588] sm:$0xff]  ;;  %v2658_v50 = vld [vmem:[%s6412_s0 + $0x590] sm:$0xff] }
  0x5a   :  { %2655 = vst [vmem:[%s6413_s2 + $0x580] sm:$0xff] %v2654_v48  ;;  %v2660_v51 = vld [vmem:[%s6412_s0 + $0x598] sm:$0xff]  ;;  %2657 = vst [vmem:[%s6413_s2 + $0x588] sm:$0xff] %v2656_v49  ;;  %v2662_v52 = vld [vmem:[%s6412_s0 + $0x5a0] sm:$0xff] }
  0x5b   :  { %2659 = vst [vmem:[%s6413_s2 + $0x590] sm:$0xff] %v2658_v50  ;;  %2661 = vst [vmem:[%s6413_s2 + $0x598] sm:$0xff] %v2660_v51  ;;  %v2664_v53 = vld [vmem:[%s6412_s0 + $0x5a8] sm:$0xff]  ;;  %v2666_v54 = vld [vmem:[%s6412_s0 + $0x5b0] sm:$0xff] }
  0x5c   :  { %2663 = vst [vmem:[%s6413_s2 + $0x5a0] sm:$0xff] %v2662_v52  ;;  %2665 = vst [vmem:[%s6413_s2 + $0x5a8] sm:$0xff] %v2664_v53  ;;  %v2668_v55 = vld [vmem:[%s6412_s0 + $0x5b8] sm:$0xff]  ;;  %v2670_v56 = vld [vmem:[%s6412_s0 + $0x5c0] sm:$0xff] }
  0x5d   :  { %2667 = vst [vmem:[%s6413_s2 + $0x5b0] sm:$0xff] %v2666_v54  ;;  %v2672_v57 = vld [vmem:[%s6412_s0 + $0x5c8] sm:$0xff]  ;;  %2669 = vst [vmem:[%s6413_s2 + $0x5b8] sm:$0xff] %v2668_v55  ;;  %v2674_v58 = vld [vmem:[%s6412_s0 + $0x5d0] sm:$0xff] }
  0x5e   :  { %2671 = vst [vmem:[%s6413_s2 + $0x5c0] sm:$0xff] %v2670_v56  ;;  %2673 = vst [vmem:[%s6413_s2 + $0x5c8] sm:$0xff] %v2672_v57  ;;  %v2676_v59 = vld [vmem:[%s6412_s0 + $0x5d8] sm:$0xff]  ;;  %v2678_v60 = vld [vmem:[%s6412_s0 + $0x5e0] sm:$0xff] }
  0x5f   :  { %2675 = vst [vmem:[%s6413_s2 + $0x5d0] sm:$0xff] %v2674_v58  ;;  %2677 = vst [vmem:[%s6413_s2 + $0x5d8] sm:$0xff] %v2676_v59  ;;  %v2680_v61 = vld [vmem:[%s6412_s0 + $0x5e8] sm:$0xff]  ;;  %v2682_v62 = vld [vmem:[%s6412_s0 + $0x5f0] sm:$0xff] }
  0x60   :  { %2679 = vst [vmem:[%s6413_s2 + $0x5e0] sm:$0xff] %v2678_v60  ;;  %v2684_v63 = vld [vmem:[%s6412_s0 + $0x5f8] sm:$0xff]  ;;  %2681 = vst [vmem:[%s6413_s2 + $0x5e8] sm:$0xff] %v2680_v61  ;;  %v2686_v0 = vld [vmem:[%s6412_s0 + $0x600] sm:$0xff] }
  0x61   :  { %2683 = vst [vmem:[%s6413_s2 + $0x5f0] sm:$0xff] %v2682_v62  ;;  %2685 = vst [vmem:[%s6413_s2 + $0x5f8] sm:$0xff] %v2684_v63  ;;  %v2688_v1 = vld [vmem:[%s6412_s0 + $0x608] sm:$0xff]  ;;  %v2690_v2 = vld [vmem:[%s6412_s0 + $0x610] sm:$0xff] }
  0x62   :  { %2687 = vst [vmem:[%s6413_s2 + $0x600] sm:$0xff] %v2686_v0  ;;  %2689 = vst [vmem:[%s6413_s2 + $0x608] sm:$0xff] %v2688_v1  ;;  %v2692_v3 = vld [vmem:[%s6412_s0 + $0x618] sm:$0xff]  ;;  %v2694_v4 = vld [vmem:[%s6412_s0 + $0x620] sm:$0xff] }
  0x63   :  { %2691 = vst [vmem:[%s6413_s2 + $0x610] sm:$0xff] %v2690_v2  ;;  %v2696_v5 = vld [vmem:[%s6412_s0 + $0x628] sm:$0xff]  ;;  %2693 = vst [vmem:[%s6413_s2 + $0x618] sm:$0xff] %v2692_v3  ;;  %v2698_v6 = vld [vmem:[%s6412_s0 + $0x630] sm:$0xff] }
  0x64   :  { %2695 = vst [vmem:[%s6413_s2 + $0x620] sm:$0xff] %v2694_v4  ;;  %2697 = vst [vmem:[%s6413_s2 + $0x628] sm:$0xff] %v2696_v5  ;;  %v2700_v7 = vld [vmem:[%s6412_s0 + $0x638] sm:$0xff]  ;;  %v2702_v8 = vld [vmem:[%s6412_s0 + $0x640] sm:$0xff] }
  0x65   :  { %2699 = vst [vmem:[%s6413_s2 + $0x630] sm:$0xff] %v2698_v6  ;;  %2701 = vst [vmem:[%s6413_s2 + $0x638] sm:$0xff] %v2700_v7  ;;  %v2704_v9 = vld [vmem:[%s6412_s0 + $0x648] sm:$0xff]  ;;  %v2706_v10 = vld [vmem:[%s6412_s0 + $0x650] sm:$0xff] }
  0x66   :  { %2703 = vst [vmem:[%s6413_s2 + $0x640] sm:$0xff] %v2702_v8  ;;  %v2708_v11 = vld [vmem:[%s6412_s0 + $0x658] sm:$0xff]  ;;  %2705 = vst [vmem:[%s6413_s2 + $0x648] sm:$0xff] %v2704_v9  ;;  %v2710_v12 = vld [vmem:[%s6412_s0 + $0x660] sm:$0xff] }
  0x67   :  { %2707 = vst [vmem:[%s6413_s2 + $0x650] sm:$0xff] %v2706_v10  ;;  %2709 = vst [vmem:[%s6413_s2 + $0x658] sm:$0xff] %v2708_v11  ;;  %v2712_v13 = vld [vmem:[%s6412_s0 + $0x668] sm:$0xff]  ;;  %v2714_v14 = vld [vmem:[%s6412_s0 + $0x670] sm:$0xff] }
  0x68   :  { %2711 = vst [vmem:[%s6413_s2 + $0x660] sm:$0xff] %v2710_v12  ;;  %2713 = vst [vmem:[%s6413_s2 + $0x668] sm:$0xff] %v2712_v13  ;;  %v2716_v15 = vld [vmem:[%s6412_s0 + $0x678] sm:$0xff]  ;;  %v2718_v16 = vld [vmem:[%s6412_s0 + $0x680] sm:$0xff] }
  0x69   :  { %2715 = vst [vmem:[%s6413_s2 + $0x670] sm:$0xff] %v2714_v14  ;;  %v2720_v17 = vld [vmem:[%s6412_s0 + $0x688] sm:$0xff]  ;;  %2717 = vst [vmem:[%s6413_s2 + $0x678] sm:$0xff] %v2716_v15  ;;  %v2722_v18 = vld [vmem:[%s6412_s0 + $0x690] sm:$0xff] }
  0x6a   :  { %2719 = vst [vmem:[%s6413_s2 + $0x680] sm:$0xff] %v2718_v16  ;;  %2721 = vst [vmem:[%s6413_s2 + $0x688] sm:$0xff] %v2720_v17  ;;  %v2724_v19 = vld [vmem:[%s6412_s0 + $0x698] sm:$0xff]  ;;  %v2726_v20 = vld [vmem:[%s6412_s0 + $0x6a0] sm:$0xff] }
  0x6b   :  { %2723 = vst [vmem:[%s6413_s2 + $0x690] sm:$0xff] %v2722_v18  ;;  %2725 = vst [vmem:[%s6413_s2 + $0x698] sm:$0xff] %v2724_v19  ;;  %v2728_v21 = vld [vmem:[%s6412_s0 + $0x6a8] sm:$0xff]  ;;  %v2730_v22 = vld [vmem:[%s6412_s0 + $0x6b0] sm:$0xff] }
  0x6c   :  { %2727 = vst [vmem:[%s6413_s2 + $0x6a0] sm:$0xff] %v2726_v20  ;;  %v2732_v23 = vld [vmem:[%s6412_s0 + $0x6b8] sm:$0xff]  ;;  %2729 = vst [vmem:[%s6413_s2 + $0x6a8] sm:$0xff] %v2728_v21  ;;  %v2734_v24 = vld [vmem:[%s6412_s0 + $0x6c0] sm:$0xff] }
  0x6d   :  { %2731 = vst [vmem:[%s6413_s2 + $0x6b0] sm:$0xff] %v2730_v22  ;;  %2733 = vst [vmem:[%s6413_s2 + $0x6b8] sm:$0xff] %v2732_v23  ;;  %v2736_v25 = vld [vmem:[%s6412_s0 + $0x6c8] sm:$0xff]  ;;  %v2738_v26 = vld [vmem:[%s6412_s0 + $0x6d0] sm:$0xff] }
  0x6e   :  { %2735 = vst [vmem:[%s6413_s2 + $0x6c0] sm:$0xff] %v2734_v24  ;;  %2737 = vst [vmem:[%s6413_s2 + $0x6c8] sm:$0xff] %v2736_v25  ;;  %v2740_v27 = vld [vmem:[%s6412_s0 + $0x6d8] sm:$0xff]  ;;  %v2742_v28 = vld [vmem:[%s6412_s0 + $0x6e0] sm:$0xff] }
  0x6f   :  { %2739 = vst [vmem:[%s6413_s2 + $0x6d0] sm:$0xff] %v2738_v26  ;;  %v2744_v29 = vld [vmem:[%s6412_s0 + $0x6e8] sm:$0xff]  ;;  %2741 = vst [vmem:[%s6413_s2 + $0x6d8] sm:$0xff] %v2740_v27  ;;  %v2746_v30 = vld [vmem:[%s6412_s0 + $0x6f0] sm:$0xff] }
  0x70   :  { %2743 = vst [vmem:[%s6413_s2 + $0x6e0] sm:$0xff] %v2742_v28  ;;  %2745 = vst [vmem:[%s6413_s2 + $0x6e8] sm:$0xff] %v2744_v29  ;;  %v2748_v31 = vld [vmem:[%s6412_s0 + $0x6f8] sm:$0xff]  ;;  %v2750_v32 = vld [vmem:[%s6412_s0 + $0x700] sm:$0xff] }
  0x71   :  { %2747 = vst [vmem:[%s6413_s2 + $0x6f0] sm:$0xff] %v2746_v30  ;;  %2749 = vst [vmem:[%s6413_s2 + $0x6f8] sm:$0xff] %v2748_v31  ;;  %v2752_v33 = vld [vmem:[%s6412_s0 + $0x708] sm:$0xff]  ;;  %v2754_v34 = vld [vmem:[%s6412_s0 + $0x710] sm:$0xff] }
  0x72   :  { %2751 = vst [vmem:[%s6413_s2 + $0x700] sm:$0xff] %v2750_v32  ;;  %v2756_v35 = vld [vmem:[%s6412_s0 + $0x718] sm:$0xff]  ;;  %2753 = vst [vmem:[%s6413_s2 + $0x708] sm:$0xff] %v2752_v33  ;;  %v2758_v36 = vld [vmem:[%s6412_s0 + $0x720] sm:$0xff] }
  0x73   :  { %2755 = vst [vmem:[%s6413_s2 + $0x710] sm:$0xff] %v2754_v34  ;;  %2757 = vst [vmem:[%s6413_s2 + $0x718] sm:$0xff] %v2756_v35  ;;  %v2760_v37 = vld [vmem:[%s6412_s0 + $0x728] sm:$0xff]  ;;  %v2762_v38 = vld [vmem:[%s6412_s0 + $0x730] sm:$0xff] }
  0x74   :  { %2759 = vst [vmem:[%s6413_s2 + $0x720] sm:$0xff] %v2758_v36  ;;  %2761 = vst [vmem:[%s6413_s2 + $0x728] sm:$0xff] %v2760_v37  ;;  %v2764_v39 = vld [vmem:[%s6412_s0 + $0x738] sm:$0xff]  ;;  %v2766_v40 = vld [vmem:[%s6412_s0 + $0x740] sm:$0xff] }
  0x75   :  { %2763 = vst [vmem:[%s6413_s2 + $0x730] sm:$0xff] %v2762_v38  ;;  %v2768_v41 = vld [vmem:[%s6412_s0 + $0x748] sm:$0xff]  ;;  %2765 = vst [vmem:[%s6413_s2 + $0x738] sm:$0xff] %v2764_v39  ;;  %v2770_v42 = vld [vmem:[%s6412_s0 + $0x750] sm:$0xff] }
  0x76   :  { %2767 = vst [vmem:[%s6413_s2 + $0x740] sm:$0xff] %v2766_v40  ;;  %2769 = vst [vmem:[%s6413_s2 + $0x748] sm:$0xff] %v2768_v41  ;;  %v2772_v43 = vld [vmem:[%s6412_s0 + $0x758] sm:$0xff]  ;;  %v2774_v44 = vld [vmem:[%s6412_s0 + $0x760] sm:$0xff] }
  0x77   :  { %2771 = vst [vmem:[%s6413_s2 + $0x750] sm:$0xff] %v2770_v42  ;;  %2773 = vst [vmem:[%s6413_s2 + $0x758] sm:$0xff] %v2772_v43  ;;  %v2776_v45 = vld [vmem:[%s6412_s0 + $0x768] sm:$0xff]  ;;  %v2778_v46 = vld [vmem:[%s6412_s0 + $0x770] sm:$0xff] }
  0x78   :  { %2775 = vst [vmem:[%s6413_s2 + $0x760] sm:$0xff] %v2774_v44  ;;  %v2780_v47 = vld [vmem:[%s6412_s0 + $0x778] sm:$0xff]  ;;  %2777 = vst [vmem:[%s6413_s2 + $0x768] sm:$0xff] %v2776_v45  ;;  %v2782_v48 = vld [vmem:[%s6412_s0 + $0x780] sm:$0xff] }
  0x79   :  { %2779 = vst [vmem:[%s6413_s2 + $0x770] sm:$0xff] %v2778_v46  ;;  %2781 = vst [vmem:[%s6413_s2 + $0x778] sm:$0xff] %v2780_v47  ;;  %v2784_v49 = vld [vmem:[%s6412_s0 + $0x788] sm:$0xff]  ;;  %v2786_v50 = vld [vmem:[%s6412_s0 + $0x790] sm:$0xff] }
  0x7a   :  { %2783 = vst [vmem:[%s6413_s2 + $0x780] sm:$0xff] %v2782_v48  ;;  %2785 = vst [vmem:[%s6413_s2 + $0x788] sm:$0xff] %v2784_v49  ;;  %v2788_v51 = vld [vmem:[%s6412_s0 + $0x798] sm:$0xff]  ;;  %v2790_v52 = vld [vmem:[%s6412_s0 + $0x7a0] sm:$0xff] }
  0x7b   :  { %2787 = vst [vmem:[%s6413_s2 + $0x790] sm:$0xff] %v2786_v50  ;;  %v2792_v53 = vld [vmem:[%s6412_s0 + $0x7a8] sm:$0xff]  ;;  %2789 = vst [vmem:[%s6413_s2 + $0x798] sm:$0xff] %v2788_v51  ;;  %v2794_v54 = vld [vmem:[%s6412_s0 + $0x7b0] sm:$0xff] }
  0x7c   :  { %2791 = vst [vmem:[%s6413_s2 + $0x7a0] sm:$0xff] %v2790_v52  ;;  %2793 = vst [vmem:[%s6413_s2 + $0x7a8] sm:$0xff] %v2792_v53  ;;  %v2796_v55 = vld [vmem:[%s6412_s0 + $0x7b8] sm:$0xff]  ;;  %v2798_v56 = vld [vmem:[%s6412_s0 + $0x7c0] sm:$0xff] }
  0x7d   :  { %2795 = vst [vmem:[%s6413_s2 + $0x7b0] sm:$0xff] %v2794_v54  ;;  %2797 = vst [vmem:[%s6413_s2 + $0x7b8] sm:$0xff] %v2796_v55  ;;  %v2800_v57 = vld [vmem:[%s6412_s0 + $0x7c8] sm:$0xff]  ;;  %v2802_v58 = vld [vmem:[%s6412_s0 + $0x7d0] sm:$0xff] }
  0x7e   :  { %2799 = vst [vmem:[%s6413_s2 + $0x7c0] sm:$0xff] %v2798_v56  ;;  %v2804_v59 = vld [vmem:[%s6412_s0 + $0x7d8] sm:$0xff]  ;;  %2801 = vst [vmem:[%s6413_s2 + $0x7c8] sm:$0xff] %v2800_v57  ;;  %v2806_v60 = vld [vmem:[%s6412_s0 + $0x7e0] sm:$0xff] }
  0x7f   :  { %2803 = vst [vmem:[%s6413_s2 + $0x7d0] sm:$0xff] %v2802_v58  ;;  %2805 = vst [vmem:[%s6413_s2 + $0x7d8] sm:$0xff] %v2804_v59  ;;  %v2808_v61 = vld [vmem:[%s6412_s0 + $0x7e8] sm:$0xff]  ;;  %v2810_v62 = vld [vmem:[%s6412_s0 + $0x7f0] sm:$0xff] }
  0x80   :  { %2807 = vst [vmem:[%s6413_s2 + $0x7e0] sm:$0xff] %v2806_v60  ;;  %2809 = vst [vmem:[%s6413_s2 + $0x7e8] sm:$0xff] %v2808_v61  ;;  %v2812_v63 = vld [vmem:[%s6412_s0 + $0x7f8] sm:$0xff]  ;;  %v1027_v0 = vld [vmem:[%s6414_s1] sm:$0xff] }
  0x81   :  { %2811 = vst [vmem:[%s6413_s2 + $0x7f0] sm:$0xff] %v2810_v62  ;;  %v2815_v1 = vld [vmem:[%s6414_s1 + $0x8] sm:$0xff]  ;;  %2813 = vst [vmem:[%s6413_s2 + $0x7f8] sm:$0xff] %v2812_v63  ;;  %v2817_v2 = vld [vmem:[%s6414_s1 + $0x10] sm:$0xff] }
  0x82   :  { %2814 = vst [vmem:[%s6413_s2 + $0x800] sm:$0xff] %v1027_v0  ;;  %2816 = vst [vmem:[%s6413_s2 + $0x808] sm:$0xff] %v2815_v1  ;;  %v2819_v3 = vld [vmem:[%s6414_s1 + $0x18] sm:$0xff]  ;;  %v2821_v4 = vld [vmem:[%s6414_s1 + $0x20] sm:$0xff] }
  0x83   :  { %2818 = vst [vmem:[%s6413_s2 + $0x810] sm:$0xff] %v2817_v2  ;;  %2820 = vst [vmem:[%s6413_s2 + $0x818] sm:$0xff] %v2819_v3  ;;  %v2823_v5 = vld [vmem:[%s6414_s1 + $0x28] sm:$0xff]  ;;  %v2825_v6 = vld [vmem:[%s6414_s1 + $0x30] sm:$0xff] }
  0x84   :  { %2822 = vst [vmem:[%s6413_s2 + $0x820] sm:$0xff] %v2821_v4  ;;  %v2827_v7 = vld [vmem:[%s6414_s1 + $0x38] sm:$0xff]  ;;  %2824 = vst [vmem:[%s6413_s2 + $0x828] sm:$0xff] %v2823_v5  ;;  %v2829_v8 = vld [vmem:[%s6414_s1 + $0x40] sm:$0xff] }
  0x85   :  { %2826 = vst [vmem:[%s6413_s2 + $0x830] sm:$0xff] %v2825_v6  ;;  %2828 = vst [vmem:[%s6413_s2 + $0x838] sm:$0xff] %v2827_v7  ;;  %v2831_v9 = vld [vmem:[%s6414_s1 + $0x48] sm:$0xff]  ;;  %v2833_v10 = vld [vmem:[%s6414_s1 + $0x50] sm:$0xff] }
  0x86   :  { %2830 = vst [vmem:[%s6413_s2 + $0x840] sm:$0xff] %v2829_v8  ;;  %2832 = vst [vmem:[%s6413_s2 + $0x848] sm:$0xff] %v2831_v9  ;;  %v2835_v11 = vld [vmem:[%s6414_s1 + $0x58] sm:$0xff]  ;;  %v2837_v12 = vld [vmem:[%s6414_s1 + $0x60] sm:$0xff] }
  0x87   :  { %2834 = vst [vmem:[%s6413_s2 + $0x850] sm:$0xff] %v2833_v10  ;;  %v2839_v13 = vld [vmem:[%s6414_s1 + $0x68] sm:$0xff]  ;;  %2836 = vst [vmem:[%s6413_s2 + $0x858] sm:$0xff] %v2835_v11  ;;  %v2841_v14 = vld [vmem:[%s6414_s1 + $0x70] sm:$0xff] }
  0x88   :  { %2838 = vst [vmem:[%s6413_s2 + $0x860] sm:$0xff] %v2837_v12  ;;  %2840 = vst [vmem:[%s6413_s2 + $0x868] sm:$0xff] %v2839_v13  ;;  %v2843_v15 = vld [vmem:[%s6414_s1 + $0x78] sm:$0xff]  ;;  %v2845_v16 = vld [vmem:[%s6414_s1 + $0x80] sm:$0xff] }
  0x89   :  { %2842 = vst [vmem:[%s6413_s2 + $0x870] sm:$0xff] %v2841_v14  ;;  %2844 = vst [vmem:[%s6413_s2 + $0x878] sm:$0xff] %v2843_v15  ;;  %v2847_v17 = vld [vmem:[%s6414_s1 + $0x88] sm:$0xff]  ;;  %v2849_v18 = vld [vmem:[%s6414_s1 + $0x90] sm:$0xff] }
  0x8a   :  { %2846 = vst [vmem:[%s6413_s2 + $0x880] sm:$0xff] %v2845_v16  ;;  %v2851_v19 = vld [vmem:[%s6414_s1 + $0x98] sm:$0xff]  ;;  %2848 = vst [vmem:[%s6413_s2 + $0x888] sm:$0xff] %v2847_v17  ;;  %v2853_v20 = vld [vmem:[%s6414_s1 + $0xa0] sm:$0xff] }
  0x8b   :  { %2850 = vst [vmem:[%s6413_s2 + $0x890] sm:$0xff] %v2849_v18  ;;  %2852 = vst [vmem:[%s6413_s2 + $0x898] sm:$0xff] %v2851_v19  ;;  %v2855_v21 = vld [vmem:[%s6414_s1 + $0xa8] sm:$0xff]  ;;  %v2857_v22 = vld [vmem:[%s6414_s1 + $0xb0] sm:$0xff] }
  0x8c   :  { %2854 = vst [vmem:[%s6413_s2 + $0x8a0] sm:$0xff] %v2853_v20  ;;  %2856 = vst [vmem:[%s6413_s2 + $0x8a8] sm:$0xff] %v2855_v21  ;;  %v2859_v23 = vld [vmem:[%s6414_s1 + $0xb8] sm:$0xff]  ;;  %v2861_v24 = vld [vmem:[%s6414_s1 + $0xc0] sm:$0xff] }
  0x8d   :  { %2858 = vst [vmem:[%s6413_s2 + $0x8b0] sm:$0xff] %v2857_v22  ;;  %v2863_v25 = vld [vmem:[%s6414_s1 + $0xc8] sm:$0xff]  ;;  %2860 = vst [vmem:[%s6413_s2 + $0x8b8] sm:$0xff] %v2859_v23  ;;  %v2865_v26 = vld [vmem:[%s6414_s1 + $0xd0] sm:$0xff] }
  0x8e   :  { %2862 = vst [vmem:[%s6413_s2 + $0x8c0] sm:$0xff] %v2861_v24  ;;  %2864 = vst [vmem:[%s6413_s2 + $0x8c8] sm:$0xff] %v2863_v25  ;;  %v2867_v27 = vld [vmem:[%s6414_s1 + $0xd8] sm:$0xff]  ;;  %v2869_v28 = vld [vmem:[%s6414_s1 + $0xe0] sm:$0xff] }
  0x8f   :  { %2866 = vst [vmem:[%s6413_s2 + $0x8d0] sm:$0xff] %v2865_v26  ;;  %2868 = vst [vmem:[%s6413_s2 + $0x8d8] sm:$0xff] %v2867_v27  ;;  %v2871_v29 = vld [vmem:[%s6414_s1 + $0xe8] sm:$0xff]  ;;  %v2873_v30 = vld [vmem:[%s6414_s1 + $0xf0] sm:$0xff] }
  0x90   :  { %2870 = vst [vmem:[%s6413_s2 + $0x8e0] sm:$0xff] %v2869_v28  ;;  %v2875_v31 = vld [vmem:[%s6414_s1 + $0xf8] sm:$0xff]  ;;  %2872 = vst [vmem:[%s6413_s2 + $0x8e8] sm:$0xff] %v2871_v29  ;;  %v2877_v32 = vld [vmem:[%s6414_s1 + $0x100] sm:$0xff] }
  0x91   :  { %2874 = vst [vmem:[%s6413_s2 + $0x8f0] sm:$0xff] %v2873_v30  ;;  %2876 = vst [vmem:[%s6413_s2 + $0x8f8] sm:$0xff] %v2875_v31  ;;  %v2879_v33 = vld [vmem:[%s6414_s1 + $0x108] sm:$0xff]  ;;  %v2881_v34 = vld [vmem:[%s6414_s1 + $0x110] sm:$0xff] }
  0x92   :  { %2878 = vst [vmem:[%s6413_s2 + $0x900] sm:$0xff] %v2877_v32  ;;  %2880 = vst [vmem:[%s6413_s2 + $0x908] sm:$0xff] %v2879_v33  ;;  %v2883_v35 = vld [vmem:[%s6414_s1 + $0x118] sm:$0xff]  ;;  %v2885_v36 = vld [vmem:[%s6414_s1 + $0x120] sm:$0xff] }
  0x93   :  { %2882 = vst [vmem:[%s6413_s2 + $0x910] sm:$0xff] %v2881_v34  ;;  %v2887_v37 = vld [vmem:[%s6414_s1 + $0x128] sm:$0xff]  ;;  %2884 = vst [vmem:[%s6413_s2 + $0x918] sm:$0xff] %v2883_v35  ;;  %v2889_v38 = vld [vmem:[%s6414_s1 + $0x130] sm:$0xff] }
  0x94   :  { %2886 = vst [vmem:[%s6413_s2 + $0x920] sm:$0xff] %v2885_v36  ;;  %2888 = vst [vmem:[%s6413_s2 + $0x928] sm:$0xff] %v2887_v37  ;;  %v2891_v39 = vld [vmem:[%s6414_s1 + $0x138] sm:$0xff]  ;;  %v2893_v40 = vld [vmem:[%s6414_s1 + $0x140] sm:$0xff] }
  0x95   :  { %2890 = vst [vmem:[%s6413_s2 + $0x930] sm:$0xff] %v2889_v38  ;;  %2892 = vst [vmem:[%s6413_s2 + $0x938] sm:$0xff] %v2891_v39  ;;  %v2895_v41 = vld [vmem:[%s6414_s1 + $0x148] sm:$0xff]  ;;  %v2897_v42 = vld [vmem:[%s6414_s1 + $0x150] sm:$0xff] }
  0x96   :  { %2894 = vst [vmem:[%s6413_s2 + $0x940] sm:$0xff] %v2893_v40  ;;  %v2899_v43 = vld [vmem:[%s6414_s1 + $0x158] sm:$0xff]  ;;  %2896 = vst [vmem:[%s6413_s2 + $0x948] sm:$0xff] %v2895_v41  ;;  %v2901_v44 = vld [vmem:[%s6414_s1 + $0x160] sm:$0xff] }
  0x97   :  { %2898 = vst [vmem:[%s6413_s2 + $0x950] sm:$0xff] %v2897_v42  ;;  %2900 = vst [vmem:[%s6413_s2 + $0x958] sm:$0xff] %v2899_v43  ;;  %v2903_v45 = vld [vmem:[%s6414_s1 + $0x168] sm:$0xff]  ;;  %v2905_v46 = vld [vmem:[%s6414_s1 + $0x170] sm:$0xff] }
  0x98   :  { %2902 = vst [vmem:[%s6413_s2 + $0x960] sm:$0xff] %v2901_v44  ;;  %2904 = vst [vmem:[%s6413_s2 + $0x968] sm:$0xff] %v2903_v45  ;;  %v2907_v47 = vld [vmem:[%s6414_s1 + $0x178] sm:$0xff]  ;;  %v2909_v48 = vld [vmem:[%s6414_s1 + $0x180] sm:$0xff] }
  0x99   :  { %2906 = vst [vmem:[%s6413_s2 + $0x970] sm:$0xff] %v2905_v46  ;;  %v2911_v49 = vld [vmem:[%s6414_s1 + $0x188] sm:$0xff]  ;;  %2908 = vst [vmem:[%s6413_s2 + $0x978] sm:$0xff] %v2907_v47  ;;  %v2913_v50 = vld [vmem:[%s6414_s1 + $0x190] sm:$0xff] }
  0x9a   :  { %2910 = vst [vmem:[%s6413_s2 + $0x980] sm:$0xff] %v2909_v48  ;;  %2912 = vst [vmem:[%s6413_s2 + $0x988] sm:$0xff] %v2911_v49  ;;  %v2915_v51 = vld [vmem:[%s6414_s1 + $0x198] sm:$0xff]  ;;  %v2917_v52 = vld [vmem:[%s6414_s1 + $0x1a0] sm:$0xff] }
  0x9b   :  { %2914 = vst [vmem:[%s6413_s2 + $0x990] sm:$0xff] %v2913_v50  ;;  %2916 = vst [vmem:[%s6413_s2 + $0x998] sm:$0xff] %v2915_v51  ;;  %v2919_v53 = vld [vmem:[%s6414_s1 + $0x1a8] sm:$0xff]  ;;  %v2921_v54 = vld [vmem:[%s6414_s1 + $0x1b0] sm:$0xff] }
  0x9c   :  { %2918 = vst [vmem:[%s6413_s2 + $0x9a0] sm:$0xff] %v2917_v52  ;;  %v2923_v55 = vld [vmem:[%s6414_s1 + $0x1b8] sm:$0xff]  ;;  %2920 = vst [vmem:[%s6413_s2 + $0x9a8] sm:$0xff] %v2919_v53  ;;  %v2925_v56 = vld [vmem:[%s6414_s1 + $0x1c0] sm:$0xff] }
  0x9d   :  { %2922 = vst [vmem:[%s6413_s2 + $0x9b0] sm:$0xff] %v2921_v54  ;;  %2924 = vst [vmem:[%s6413_s2 + $0x9b8] sm:$0xff] %v2923_v55  ;;  %v2927_v57 = vld [vmem:[%s6414_s1 + $0x1c8] sm:$0xff]  ;;  %v2929_v58 = vld [vmem:[%s6414_s1 + $0x1d0] sm:$0xff] }
  0x9e   :  { %2926 = vst [vmem:[%s6413_s2 + $0x9c0] sm:$0xff] %v2925_v56  ;;  %2928 = vst [vmem:[%s6413_s2 + $0x9c8] sm:$0xff] %v2927_v57  ;;  %v2931_v59 = vld [vmem:[%s6414_s1 + $0x1d8] sm:$0xff]  ;;  %v2933_v60 = vld [vmem:[%s6414_s1 + $0x1e0] sm:$0xff] }
  0x9f   :  { %2930 = vst [vmem:[%s6413_s2 + $0x9d0] sm:$0xff] %v2929_v58  ;;  %v2935_v61 = vld [vmem:[%s6414_s1 + $0x1e8] sm:$0xff]  ;;  %2932 = vst [vmem:[%s6413_s2 + $0x9d8] sm:$0xff] %v2931_v59  ;;  %v2937_v62 = vld [vmem:[%s6414_s1 + $0x1f0] sm:$0xff] }
  0xa0   :  { %2934 = vst [vmem:[%s6413_s2 + $0x9e0] sm:$0xff] %v2933_v60  ;;  %2936 = vst [vmem:[%s6413_s2 + $0x9e8] sm:$0xff] %v2935_v61  ;;  %v2939_v63 = vld [vmem:[%s6414_s1 + $0x1f8] sm:$0xff]  ;;  %v2941_v0 = vld [vmem:[%s6414_s1 + $0x200] sm:$0xff] }
  0xa1   :  { %2938 = vst [vmem:[%s6413_s2 + $0x9f0] sm:$0xff] %v2937_v62  ;;  %2940 = vst [vmem:[%s6413_s2 + $0x9f8] sm:$0xff] %v2939_v63  ;;  %v2943_v1 = vld [vmem:[%s6414_s1 + $0x208] sm:$0xff]  ;;  %v2945_v2 = vld [vmem:[%s6414_s1 + $0x210] sm:$0xff] }
  0xa2   :  { %2942 = vst [vmem:[%s6413_s2 + $0xa00] sm:$0xff] %v2941_v0  ;;  %v2947_v3 = vld [vmem:[%s6414_s1 + $0x218] sm:$0xff]  ;;  %2944 = vst [vmem:[%s6413_s2 + $0xa08] sm:$0xff] %v2943_v1  ;;  %v2949_v4 = vld [vmem:[%s6414_s1 + $0x220] sm:$0xff] }
  0xa3   :  { %2946 = vst [vmem:[%s6413_s2 + $0xa10] sm:$0xff] %v2945_v2  ;;  %2948 = vst [vmem:[%s6413_s2 + $0xa18] sm:$0xff] %v2947_v3  ;;  %v2951_v5 = vld [vmem:[%s6414_s1 + $0x228] sm:$0xff]  ;;  %v2953_v6 = vld [vmem:[%s6414_s1 + $0x230] sm:$0xff] }
  0xa4   :  { %2950 = vst [vmem:[%s6413_s2 + $0xa20] sm:$0xff] %v2949_v4  ;;  %2952 = vst [vmem:[%s6413_s2 + $0xa28] sm:$0xff] %v2951_v5  ;;  %v2955_v7 = vld [vmem:[%s6414_s1 + $0x238] sm:$0xff]  ;;  %v2957_v8 = vld [vmem:[%s6414_s1 + $0x240] sm:$0xff] }
  0xa5   :  { %2954 = vst [vmem:[%s6413_s2 + $0xa30] sm:$0xff] %v2953_v6  ;;  %v2959_v9 = vld [vmem:[%s6414_s1 + $0x248] sm:$0xff]  ;;  %2956 = vst [vmem:[%s6413_s2 + $0xa38] sm:$0xff] %v2955_v7  ;;  %v2961_v10 = vld [vmem:[%s6414_s1 + $0x250] sm:$0xff] }
  0xa6   :  { %2958 = vst [vmem:[%s6413_s2 + $0xa40] sm:$0xff] %v2957_v8  ;;  %2960 = vst [vmem:[%s6413_s2 + $0xa48] sm:$0xff] %v2959_v9  ;;  %v2963_v11 = vld [vmem:[%s6414_s1 + $0x258] sm:$0xff]  ;;  %v2965_v12 = vld [vmem:[%s6414_s1 + $0x260] sm:$0xff] }
  0xa7   :  { %2962 = vst [vmem:[%s6413_s2 + $0xa50] sm:$0xff] %v2961_v10  ;;  %2964 = vst [vmem:[%s6413_s2 + $0xa58] sm:$0xff] %v2963_v11  ;;  %v2967_v13 = vld [vmem:[%s6414_s1 + $0x268] sm:$0xff]  ;;  %v2969_v14 = vld [vmem:[%s6414_s1 + $0x270] sm:$0xff] }
  0xa8   :  { %2966 = vst [vmem:[%s6413_s2 + $0xa60] sm:$0xff] %v2965_v12  ;;  %v2971_v15 = vld [vmem:[%s6414_s1 + $0x278] sm:$0xff]  ;;  %2968 = vst [vmem:[%s6413_s2 + $0xa68] sm:$0xff] %v2967_v13  ;;  %v2973_v16 = vld [vmem:[%s6414_s1 + $0x280] sm:$0xff] }
  0xa9   :  { %2970 = vst [vmem:[%s6413_s2 + $0xa70] sm:$0xff] %v2969_v14  ;;  %2972 = vst [vmem:[%s6413_s2 + $0xa78] sm:$0xff] %v2971_v15  ;;  %v2975_v17 = vld [vmem:[%s6414_s1 + $0x288] sm:$0xff]  ;;  %v2977_v18 = vld [vmem:[%s6414_s1 + $0x290] sm:$0xff] }
  0xaa   :  { %2974 = vst [vmem:[%s6413_s2 + $0xa80] sm:$0xff] %v2973_v16  ;;  %2976 = vst [vmem:[%s6413_s2 + $0xa88] sm:$0xff] %v2975_v17  ;;  %v2979_v19 = vld [vmem:[%s6414_s1 + $0x298] sm:$0xff]  ;;  %v2981_v20 = vld [vmem:[%s6414_s1 + $0x2a0] sm:$0xff] }
  0xab   :  { %2978 = vst [vmem:[%s6413_s2 + $0xa90] sm:$0xff] %v2977_v18  ;;  %v2983_v21 = vld [vmem:[%s6414_s1 + $0x2a8] sm:$0xff]  ;;  %2980 = vst [vmem:[%s6413_s2 + $0xa98] sm:$0xff] %v2979_v19  ;;  %v2985_v22 = vld [vmem:[%s6414_s1 + $0x2b0] sm:$0xff] }
  0xac   :  { %2982 = vst [vmem:[%s6413_s2 + $0xaa0] sm:$0xff] %v2981_v20  ;;  %2984 = vst [vmem:[%s6413_s2 + $0xaa8] sm:$0xff] %v2983_v21  ;;  %v2987_v23 = vld [vmem:[%s6414_s1 + $0x2b8] sm:$0xff]  ;;  %v2989_v24 = vld [vmem:[%s6414_s1 + $0x2c0] sm:$0xff] }
  0xad   :  { %2986 = vst [vmem:[%s6413_s2 + $0xab0] sm:$0xff] %v2985_v22  ;;  %2988 = vst [vmem:[%s6413_s2 + $0xab8] sm:$0xff] %v2987_v23  ;;  %v2991_v25 = vld [vmem:[%s6414_s1 + $0x2c8] sm:$0xff]  ;;  %v2993_v26 = vld [vmem:[%s6414_s1 + $0x2d0] sm:$0xff] }
  0xae   :  { %2990 = vst [vmem:[%s6413_s2 + $0xac0] sm:$0xff] %v2989_v24  ;;  %v2995_v27 = vld [vmem:[%s6414_s1 + $0x2d8] sm:$0xff]  ;;  %2992 = vst [vmem:[%s6413_s2 + $0xac8] sm:$0xff] %v2991_v25  ;;  %v2997_v28 = vld [vmem:[%s6414_s1 + $0x2e0] sm:$0xff] }
  0xaf   :  { %2994 = vst [vmem:[%s6413_s2 + $0xad0] sm:$0xff] %v2993_v26  ;;  %2996 = vst [vmem:[%s6413_s2 + $0xad8] sm:$0xff] %v2995_v27  ;;  %v2999_v29 = vld [vmem:[%s6414_s1 + $0x2e8] sm:$0xff]  ;;  %v3001_v30 = vld [vmem:[%s6414_s1 + $0x2f0] sm:$0xff] }
  0xb0   :  { %2998 = vst [vmem:[%s6413_s2 + $0xae0] sm:$0xff] %v2997_v28  ;;  %3000 = vst [vmem:[%s6413_s2 + $0xae8] sm:$0xff] %v2999_v29  ;;  %v3003_v31 = vld [vmem:[%s6414_s1 + $0x2f8] sm:$0xff]  ;;  %v3005_v32 = vld [vmem:[%s6414_s1 + $0x300] sm:$0xff] }
  0xb1   :  { %3002 = vst [vmem:[%s6413_s2 + $0xaf0] sm:$0xff] %v3001_v30  ;;  %v3007_v33 = vld [vmem:[%s6414_s1 + $0x308] sm:$0xff]  ;;  %3004 = vst [vmem:[%s6413_s2 + $0xaf8] sm:$0xff] %v3003_v31  ;;  %v3009_v34 = vld [vmem:[%s6414_s1 + $0x310] sm:$0xff] }
  0xb2   :  { %3006 = vst [vmem:[%s6413_s2 + $0xb00] sm:$0xff] %v3005_v32  ;;  %3008 = vst [vmem:[%s6413_s2 + $0xb08] sm:$0xff] %v3007_v33  ;;  %v3011_v35 = vld [vmem:[%s6414_s1 + $0x318] sm:$0xff]  ;;  %v3013_v36 = vld [vmem:[%s6414_s1 + $0x320] sm:$0xff] }
  0xb3   :  { %3010 = vst [vmem:[%s6413_s2 + $0xb10] sm:$0xff] %v3009_v34  ;;  %3012 = vst [vmem:[%s6413_s2 + $0xb18] sm:$0xff] %v3011_v35  ;;  %v3015_v37 = vld [vmem:[%s6414_s1 + $0x328] sm:$0xff]  ;;  %v3017_v38 = vld [vmem:[%s6414_s1 + $0x330] sm:$0xff] }
  0xb4   :  { %3014 = vst [vmem:[%s6413_s2 + $0xb20] sm:$0xff] %v3013_v36  ;;  %v3019_v39 = vld [vmem:[%s6414_s1 + $0x338] sm:$0xff]  ;;  %3016 = vst [vmem:[%s6413_s2 + $0xb28] sm:$0xff] %v3015_v37  ;;  %v3021_v40 = vld [vmem:[%s6414_s1 + $0x340] sm:$0xff] }
  0xb5   :  { %3018 = vst [vmem:[%s6413_s2 + $0xb30] sm:$0xff] %v3017_v38  ;;  %3020 = vst [vmem:[%s6413_s2 + $0xb38] sm:$0xff] %v3019_v39  ;;  %v3023_v41 = vld [vmem:[%s6414_s1 + $0x348] sm:$0xff]  ;;  %v3025_v42 = vld [vmem:[%s6414_s1 + $0x350] sm:$0xff] }
  0xb6   :  { %3022 = vst [vmem:[%s6413_s2 + $0xb40] sm:$0xff] %v3021_v40  ;;  %3024 = vst [vmem:[%s6413_s2 + $0xb48] sm:$0xff] %v3023_v41  ;;  %v3027_v43 = vld [vmem:[%s6414_s1 + $0x358] sm:$0xff]  ;;  %v3029_v44 = vld [vmem:[%s6414_s1 + $0x360] sm:$0xff] }
  0xb7   :  { %3026 = vst [vmem:[%s6413_s2 + $0xb50] sm:$0xff] %v3025_v42  ;;  %v3031_v45 = vld [vmem:[%s6414_s1 + $0x368] sm:$0xff]  ;;  %3028 = vst [vmem:[%s6413_s2 + $0xb58] sm:$0xff] %v3027_v43  ;;  %v3033_v46 = vld [vmem:[%s6414_s1 + $0x370] sm:$0xff] }
  0xb8   :  { %3030 = vst [vmem:[%s6413_s2 + $0xb60] sm:$0xff] %v3029_v44  ;;  %3032 = vst [vmem:[%s6413_s2 + $0xb68] sm:$0xff] %v3031_v45  ;;  %v3035_v47 = vld [vmem:[%s6414_s1 + $0x378] sm:$0xff]  ;;  %v3037_v48 = vld [vmem:[%s6414_s1 + $0x380] sm:$0xff] }
  0xb9   :  { %3034 = vst [vmem:[%s6413_s2 + $0xb70] sm:$0xff] %v3033_v46  ;;  %3036 = vst [vmem:[%s6413_s2 + $0xb78] sm:$0xff] %v3035_v47  ;;  %v3039_v49 = vld [vmem:[%s6414_s1 + $0x388] sm:$0xff]  ;;  %v3041_v50 = vld [vmem:[%s6414_s1 + $0x390] sm:$0xff] }
  0xba   :  { %3038 = vst [vmem:[%s6413_s2 + $0xb80] sm:$0xff] %v3037_v48  ;;  %v3043_v51 = vld [vmem:[%s6414_s1 + $0x398] sm:$0xff]  ;;  %3040 = vst [vmem:[%s6413_s2 + $0xb88] sm:$0xff] %v3039_v49  ;;  %v3045_v52 = vld [vmem:[%s6414_s1 + $0x3a0] sm:$0xff] }
  0xbb   :  { %3042 = vst [vmem:[%s6413_s2 + $0xb90] sm:$0xff] %v3041_v50  ;;  %3044 = vst [vmem:[%s6413_s2 + $0xb98] sm:$0xff] %v3043_v51  ;;  %v3047_v53 = vld [vmem:[%s6414_s1 + $0x3a8] sm:$0xff]  ;;  %v3049_v54 = vld [vmem:[%s6414_s1 + $0x3b0] sm:$0xff] }
  0xbc   :  { %3046 = vst [vmem:[%s6413_s2 + $0xba0] sm:$0xff] %v3045_v52  ;;  %3048 = vst [vmem:[%s6413_s2 + $0xba8] sm:$0xff] %v3047_v53  ;;  %v3051_v55 = vld [vmem:[%s6414_s1 + $0x3b8] sm:$0xff]  ;;  %v3053_v56 = vld [vmem:[%s6414_s1 + $0x3c0] sm:$0xff] }
  0xbd   :  { %3050 = vst [vmem:[%s6413_s2 + $0xbb0] sm:$0xff] %v3049_v54  ;;  %v3055_v57 = vld [vmem:[%s6414_s1 + $0x3c8] sm:$0xff]  ;;  %3052 = vst [vmem:[%s6413_s2 + $0xbb8] sm:$0xff] %v3051_v55  ;;  %v3057_v58 = vld [vmem:[%s6414_s1 + $0x3d0] sm:$0xff] }
  0xbe   :  { %3054 = vst [vmem:[%s6413_s2 + $0xbc0] sm:$0xff] %v3053_v56  ;;  %3056 = vst [vmem:[%s6413_s2 + $0xbc8] sm:$0xff] %v3055_v57  ;;  %v3059_v59 = vld [vmem:[%s6414_s1 + $0x3d8] sm:$0xff]  ;;  %v3061_v60 = vld [vmem:[%s6414_s1 + $0x3e0] sm:$0xff] }
  0xbf   :  { %3058 = vst [vmem:[%s6413_s2 + $0xbd0] sm:$0xff] %v3057_v58  ;;  %3060 = vst [vmem:[%s6413_s2 + $0xbd8] sm:$0xff] %v3059_v59  ;;  %v3063_v61 = vld [vmem:[%s6414_s1 + $0x3e8] sm:$0xff]  ;;  %v3065_v62 = vld [vmem:[%s6414_s1 + $0x3f0] sm:$0xff] }
  0xc0   :  { %3062 = vst [vmem:[%s6413_s2 + $0xbe0] sm:$0xff] %v3061_v60  ;;  %v3067_v63 = vld [vmem:[%s6414_s1 + $0x3f8] sm:$0xff]  ;;  %3064 = vst [vmem:[%s6413_s2 + $0xbe8] sm:$0xff] %v3063_v61  ;;  %v3069_v0 = vld [vmem:[%s6414_s1 + $0x400] sm:$0xff] }
  0xc1   :  { %3066 = vst [vmem:[%s6413_s2 + $0xbf0] sm:$0xff] %v3065_v62  ;;  %3068 = vst [vmem:[%s6413_s2 + $0xbf8] sm:$0xff] %v3067_v63  ;;  %v3071_v1 = vld [vmem:[%s6414_s1 + $0x408] sm:$0xff]  ;;  %v3073_v2 = vld [vmem:[%s6414_s1 + $0x410] sm:$0xff] }
  0xc2   :  { %3070 = vst [vmem:[%s6413_s2 + $0xc00] sm:$0xff] %v3069_v0  ;;  %3072 = vst [vmem:[%s6413_s2 + $0xc08] sm:$0xff] %v3071_v1  ;;  %v3075_v3 = vld [vmem:[%s6414_s1 + $0x418] sm:$0xff]  ;;  %v3077_v4 = vld [vmem:[%s6414_s1 + $0x420] sm:$0xff] }
  0xc3   :  { %3074 = vst [vmem:[%s6413_s2 + $0xc10] sm:$0xff] %v3073_v2  ;;  %v3079_v5 = vld [vmem:[%s6414_s1 + $0x428] sm:$0xff]  ;;  %3076 = vst [vmem:[%s6413_s2 + $0xc18] sm:$0xff] %v3075_v3  ;;  %v3081_v6 = vld [vmem:[%s6414_s1 + $0x430] sm:$0xff] }
  0xc4   :  { %3078 = vst [vmem:[%s6413_s2 + $0xc20] sm:$0xff] %v3077_v4  ;;  %3080 = vst [vmem:[%s6413_s2 + $0xc28] sm:$0xff] %v3079_v5  ;;  %v3083_v7 = vld [vmem:[%s6414_s1 + $0x438] sm:$0xff]  ;;  %v3085_v8 = vld [vmem:[%s6414_s1 + $0x440] sm:$0xff] }
  0xc5   :  { %3082 = vst [vmem:[%s6413_s2 + $0xc30] sm:$0xff] %v3081_v6  ;;  %3084 = vst [vmem:[%s6413_s2 + $0xc38] sm:$0xff] %v3083_v7  ;;  %v3087_v9 = vld [vmem:[%s6414_s1 + $0x448] sm:$0xff]  ;;  %v3089_v10 = vld [vmem:[%s6414_s1 + $0x450] sm:$0xff] }
  0xc6   :  { %3086 = vst [vmem:[%s6413_s2 + $0xc40] sm:$0xff] %v3085_v8  ;;  %v3091_v11 = vld [vmem:[%s6414_s1 + $0x458] sm:$0xff]  ;;  %3088 = vst [vmem:[%s6413_s2 + $0xc48] sm:$0xff] %v3087_v9  ;;  %v3093_v12 = vld [vmem:[%s6414_s1 + $0x460] sm:$0xff] }
  0xc7   :  { %3090 = vst [vmem:[%s6413_s2 + $0xc50] sm:$0xff] %v3089_v10  ;;  %3092 = vst [vmem:[%s6413_s2 + $0xc58] sm:$0xff] %v3091_v11  ;;  %v3095_v13 = vld [vmem:[%s6414_s1 + $0x468] sm:$0xff]  ;;  %v3097_v14 = vld [vmem:[%s6414_s1 + $0x470] sm:$0xff] }
  0xc8   :  { %3094 = vst [vmem:[%s6413_s2 + $0xc60] sm:$0xff] %v3093_v12  ;;  %3096 = vst [vmem:[%s6413_s2 + $0xc68] sm:$0xff] %v3095_v13  ;;  %v3099_v15 = vld [vmem:[%s6414_s1 + $0x478] sm:$0xff]  ;;  %v3101_v16 = vld [vmem:[%s6414_s1 + $0x480] sm:$0xff] }
  0xc9   :  { %3098 = vst [vmem:[%s6413_s2 + $0xc70] sm:$0xff] %v3097_v14  ;;  %v3103_v17 = vld [vmem:[%s6414_s1 + $0x488] sm:$0xff]  ;;  %3100 = vst [vmem:[%s6413_s2 + $0xc78] sm:$0xff] %v3099_v15  ;;  %v3105_v18 = vld [vmem:[%s6414_s1 + $0x490] sm:$0xff] }
  0xca   :  { %3102 = vst [vmem:[%s6413_s2 + $0xc80] sm:$0xff] %v3101_v16  ;;  %3104 = vst [vmem:[%s6413_s2 + $0xc88] sm:$0xff] %v3103_v17  ;;  %v3107_v19 = vld [vmem:[%s6414_s1 + $0x498] sm:$0xff]  ;;  %v3109_v20 = vld [vmem:[%s6414_s1 + $0x4a0] sm:$0xff] }
  0xcb   :  { %3106 = vst [vmem:[%s6413_s2 + $0xc90] sm:$0xff] %v3105_v18  ;;  %3108 = vst [vmem:[%s6413_s2 + $0xc98] sm:$0xff] %v3107_v19  ;;  %v3111_v21 = vld [vmem:[%s6414_s1 + $0x4a8] sm:$0xff]  ;;  %v3113_v22 = vld [vmem:[%s6414_s1 + $0x4b0] sm:$0xff] }
  0xcc   :  { %3110 = vst [vmem:[%s6413_s2 + $0xca0] sm:$0xff] %v3109_v20  ;;  %v3115_v23 = vld [vmem:[%s6414_s1 + $0x4b8] sm:$0xff]  ;;  %3112 = vst [vmem:[%s6413_s2 + $0xca8] sm:$0xff] %v3111_v21  ;;  %v3117_v24 = vld [vmem:[%s6414_s1 + $0x4c0] sm:$0xff] }
  0xcd   :  { %3114 = vst [vmem:[%s6413_s2 + $0xcb0] sm:$0xff] %v3113_v22  ;;  %3116 = vst [vmem:[%s6413_s2 + $0xcb8] sm:$0xff] %v3115_v23  ;;  %v3119_v25 = vld [vmem:[%s6414_s1 + $0x4c8] sm:$0xff]  ;;  %v3121_v26 = vld [vmem:[%s6414_s1 + $0x4d0] sm:$0xff] }
  0xce   :  { %3118 = vst [vmem:[%s6413_s2 + $0xcc0] sm:$0xff] %v3117_v24  ;;  %3120 = vst [vmem:[%s6413_s2 + $0xcc8] sm:$0xff] %v3119_v25  ;;  %v3123_v27 = vld [vmem:[%s6414_s1 + $0x4d8] sm:$0xff]  ;;  %v3125_v28 = vld [vmem:[%s6414_s1 + $0x4e0] sm:$0xff] }
  0xcf   :  { %3122 = vst [vmem:[%s6413_s2 + $0xcd0] sm:$0xff] %v3121_v26  ;;  %v3127_v29 = vld [vmem:[%s6414_s1 + $0x4e8] sm:$0xff]  ;;  %3124 = vst [vmem:[%s6413_s2 + $0xcd8] sm:$0xff] %v3123_v27  ;;  %v3129_v30 = vld [vmem:[%s6414_s1 + $0x4f0] sm:$0xff] }
  0xd0   :  { %3126 = vst [vmem:[%s6413_s2 + $0xce0] sm:$0xff] %v3125_v28  ;;  %3128 = vst [vmem:[%s6413_s2 + $0xce8] sm:$0xff] %v3127_v29  ;;  %v3131_v31 = vld [vmem:[%s6414_s1 + $0x4f8] sm:$0xff]  ;;  %v3133_v32 = vld [vmem:[%s6414_s1 + $0x500] sm:$0xff] }
  0xd1   :  { %3130 = vst [vmem:[%s6413_s2 + $0xcf0] sm:$0xff] %v3129_v30  ;;  %3132 = vst [vmem:[%s6413_s2 + $0xcf8] sm:$0xff] %v3131_v31  ;;  %v3135_v33 = vld [vmem:[%s6414_s1 + $0x508] sm:$0xff]  ;;  %v3137_v34 = vld [vmem:[%s6414_s1 + $0x510] sm:$0xff] }
  0xd2   :  { %3134 = vst [vmem:[%s6413_s2 + $0xd00] sm:$0xff] %v3133_v32  ;;  %v3139_v35 = vld [vmem:[%s6414_s1 + $0x518] sm:$0xff]  ;;  %3136 = vst [vmem:[%s6413_s2 + $0xd08] sm:$0xff] %v3135_v33  ;;  %v3141_v36 = vld [vmem:[%s6414_s1 + $0x520] sm:$0xff] }
  0xd3   :  { %3138 = vst [vmem:[%s6413_s2 + $0xd10] sm:$0xff] %v3137_v34  ;;  %3140 = vst [vmem:[%s6413_s2 + $0xd18] sm:$0xff] %v3139_v35  ;;  %v3143_v37 = vld [vmem:[%s6414_s1 + $0x528] sm:$0xff]  ;;  %v3145_v38 = vld [vmem:[%s6414_s1 + $0x530] sm:$0xff] }
  0xd4   :  { %3142 = vst [vmem:[%s6413_s2 + $0xd20] sm:$0xff] %v3141_v36  ;;  %3144 = vst [vmem:[%s6413_s2 + $0xd28] sm:$0xff] %v3143_v37  ;;  %v3147_v39 = vld [vmem:[%s6414_s1 + $0x538] sm:$0xff]  ;;  %v3149_v40 = vld [vmem:[%s6414_s1 + $0x540] sm:$0xff] }
  0xd5   :  { %3146 = vst [vmem:[%s6413_s2 + $0xd30] sm:$0xff] %v3145_v38  ;;  %v3151_v41 = vld [vmem:[%s6414_s1 + $0x548] sm:$0xff]  ;;  %3148 = vst [vmem:[%s6413_s2 + $0xd38] sm:$0xff] %v3147_v39  ;;  %v3153_v42 = vld [vmem:[%s6414_s1 + $0x550] sm:$0xff] }
  0xd6   :  { %3150 = vst [vmem:[%s6413_s2 + $0xd40] sm:$0xff] %v3149_v40  ;;  %3152 = vst [vmem:[%s6413_s2 + $0xd48] sm:$0xff] %v3151_v41  ;;  %v3155_v43 = vld [vmem:[%s6414_s1 + $0x558] sm:$0xff]  ;;  %v3157_v44 = vld [vmem:[%s6414_s1 + $0x560] sm:$0xff] }
  0xd7   :  { %3154 = vst [vmem:[%s6413_s2 + $0xd50] sm:$0xff] %v3153_v42  ;;  %3156 = vst [vmem:[%s6413_s2 + $0xd58] sm:$0xff] %v3155_v43  ;;  %v3159_v45 = vld [vmem:[%s6414_s1 + $0x568] sm:$0xff]  ;;  %v3161_v46 = vld [vmem:[%s6414_s1 + $0x570] sm:$0xff] }
  0xd8   :  { %3158 = vst [vmem:[%s6413_s2 + $0xd60] sm:$0xff] %v3157_v44  ;;  %v3163_v47 = vld [vmem:[%s6414_s1 + $0x578] sm:$0xff]  ;;  %3160 = vst [vmem:[%s6413_s2 + $0xd68] sm:$0xff] %v3159_v45  ;;  %v3165_v48 = vld [vmem:[%s6414_s1 + $0x580] sm:$0xff] }
  0xd9   :  { %3162 = vst [vmem:[%s6413_s2 + $0xd70] sm:$0xff] %v3161_v46  ;;  %3164 = vst [vmem:[%s6413_s2 + $0xd78] sm:$0xff] %v3163_v47  ;;  %v3167_v49 = vld [vmem:[%s6414_s1 + $0x588] sm:$0xff]  ;;  %v3169_v50 = vld [vmem:[%s6414_s1 + $0x590] sm:$0xff] }
  0xda   :  { %3166 = vst [vmem:[%s6413_s2 + $0xd80] sm:$0xff] %v3165_v48  ;;  %3168 = vst [vmem:[%s6413_s2 + $0xd88] sm:$0xff] %v3167_v49  ;;  %v3171_v51 = vld [vmem:[%s6414_s1 + $0x598] sm:$0xff]  ;;  %v3173_v52 = vld [vmem:[%s6414_s1 + $0x5a0] sm:$0xff] }
  0xdb   :  { %3170 = vst [vmem:[%s6413_s2 + $0xd90] sm:$0xff] %v3169_v50  ;;  %v3175_v53 = vld [vmem:[%s6414_s1 + $0x5a8] sm:$0xff]  ;;  %3172 = vst [vmem:[%s6413_s2 + $0xd98] sm:$0xff] %v3171_v51  ;;  %v3177_v54 = vld [vmem:[%s6414_s1 + $0x5b0] sm:$0xff] }
  0xdc   :  { %3174 = vst [vmem:[%s6413_s2 + $0xda0] sm:$0xff] %v3173_v52  ;;  %3176 = vst [vmem:[%s6413_s2 + $0xda8] sm:$0xff] %v3175_v53  ;;  %v3179_v55 = vld [vmem:[%s6414_s1 + $0x5b8] sm:$0xff]  ;;  %v3181_v56 = vld [vmem:[%s6414_s1 + $0x5c0] sm:$0xff] }
  0xdd   :  { %3178 = vst [vmem:[%s6413_s2 + $0xdb0] sm:$0xff] %v3177_v54  ;;  %3180 = vst [vmem:[%s6413_s2 + $0xdb8] sm:$0xff] %v3179_v55  ;;  %v3183_v57 = vld [vmem:[%s6414_s1 + $0x5c8] sm:$0xff]  ;;  %v3185_v58 = vld [vmem:[%s6414_s1 + $0x5d0] sm:$0xff] }
  0xde   :  { %3182 = vst [vmem:[%s6413_s2 + $0xdc0] sm:$0xff] %v3181_v56  ;;  %v3187_v59 = vld [vmem:[%s6414_s1 + $0x5d8] sm:$0xff]  ;;  %3184 = vst [vmem:[%s6413_s2 + $0xdc8] sm:$0xff] %v3183_v57  ;;  %v3189_v60 = vld [vmem:[%s6414_s1 + $0x5e0] sm:$0xff] }
  0xdf   :  { %3186 = vst [vmem:[%s6413_s2 + $0xdd0] sm:$0xff] %v3185_v58  ;;  %3188 = vst [vmem:[%s6413_s2 + $0xdd8] sm:$0xff] %v3187_v59  ;;  %v3191_v61 = vld [vmem:[%s6414_s1 + $0x5e8] sm:$0xff]  ;;  %v3193_v62 = vld [vmem:[%s6414_s1 + $0x5f0] sm:$0xff] }
  0xe0   :  { %3190 = vst [vmem:[%s6413_s2 + $0xde0] sm:$0xff] %v3189_v60  ;;  %3192 = vst [vmem:[%s6413_s2 + $0xde8] sm:$0xff] %v3191_v61  ;;  %v3195_v63 = vld [vmem:[%s6414_s1 + $0x5f8] sm:$0xff]  ;;  %v3197_v0 = vld [vmem:[%s6414_s1 + $0x600] sm:$0xff] }
  0xe1   :  { %3194 = vst [vmem:[%s6413_s2 + $0xdf0] sm:$0xff] %v3193_v62  ;;  %v3199_v1 = vld [vmem:[%s6414_s1 + $0x608] sm:$0xff]  ;;  %3196 = vst [vmem:[%s6413_s2 + $0xdf8] sm:$0xff] %v3195_v63  ;;  %v3201_v2 = vld [vmem:[%s6414_s1 + $0x610] sm:$0xff] }
  0xe2   :  { %3198 = vst [vmem:[%s6413_s2 + $0xe00] sm:$0xff] %v3197_v0  ;;  %3200 = vst [vmem:[%s6413_s2 + $0xe08] sm:$0xff] %v3199_v1  ;;  %v3203_v3 = vld [vmem:[%s6414_s1 + $0x618] sm:$0xff]  ;;  %v3205_v4 = vld [vmem:[%s6414_s1 + $0x620] sm:$0xff] }
  0xe3   :  { %3202 = vst [vmem:[%s6413_s2 + $0xe10] sm:$0xff] %v3201_v2  ;;  %3204 = vst [vmem:[%s6413_s2 + $0xe18] sm:$0xff] %v3203_v3  ;;  %v3207_v5 = vld [vmem:[%s6414_s1 + $0x628] sm:$0xff]  ;;  %v3209_v6 = vld [vmem:[%s6414_s1 + $0x630] sm:$0xff] }
  0xe4   :  { %3206 = vst [vmem:[%s6413_s2 + $0xe20] sm:$0xff] %v3205_v4  ;;  %v3211_v7 = vld [vmem:[%s6414_s1 + $0x638] sm:$0xff]  ;;  %3208 = vst [vmem:[%s6413_s2 + $0xe28] sm:$0xff] %v3207_v5  ;;  %v3213_v8 = vld [vmem:[%s6414_s1 + $0x640] sm:$0xff] }
  0xe5   :  { %3210 = vst [vmem:[%s6413_s2 + $0xe30] sm:$0xff] %v3209_v6  ;;  %3212 = vst [vmem:[%s6413_s2 + $0xe38] sm:$0xff] %v3211_v7  ;;  %v3215_v9 = vld [vmem:[%s6414_s1 + $0x648] sm:$0xff]  ;;  %v3217_v10 = vld [vmem:[%s6414_s1 + $0x650] sm:$0xff] }
  0xe6   :  { %3214 = vst [vmem:[%s6413_s2 + $0xe40] sm:$0xff] %v3213_v8  ;;  %3216 = vst [vmem:[%s6413_s2 + $0xe48] sm:$0xff] %v3215_v9  ;;  %v3219_v11 = vld [vmem:[%s6414_s1 + $0x658] sm:$0xff]  ;;  %v3221_v12 = vld [vmem:[%s6414_s1 + $0x660] sm:$0xff] }
  0xe7   :  { %3218 = vst [vmem:[%s6413_s2 + $0xe50] sm:$0xff] %v3217_v10  ;;  %v3223_v13 = vld [vmem:[%s6414_s1 + $0x668] sm:$0xff]  ;;  %3220 = vst [vmem:[%s6413_s2 + $0xe58] sm:$0xff] %v3219_v11  ;;  %v3225_v14 = vld [vmem:[%s6414_s1 + $0x670] sm:$0xff] }
  0xe8   :  { %3222 = vst [vmem:[%s6413_s2 + $0xe60] sm:$0xff] %v3221_v12  ;;  %3224 = vst [vmem:[%s6413_s2 + $0xe68] sm:$0xff] %v3223_v13  ;;  %v3227_v15 = vld [vmem:[%s6414_s1 + $0x678] sm:$0xff]  ;;  %v3229_v16 = vld [vmem:[%s6414_s1 + $0x680] sm:$0xff] }
  0xe9   :  { %3226 = vst [vmem:[%s6413_s2 + $0xe70] sm:$0xff] %v3225_v14  ;;  %3228 = vst [vmem:[%s6413_s2 + $0xe78] sm:$0xff] %v3227_v15  ;;  %v3231_v17 = vld [vmem:[%s6414_s1 + $0x688] sm:$0xff]  ;;  %v3233_v18 = vld [vmem:[%s6414_s1 + $0x690] sm:$0xff] }
  0xea   :  { %3230 = vst [vmem:[%s6413_s2 + $0xe80] sm:$0xff] %v3229_v16  ;;  %v3235_v19 = vld [vmem:[%s6414_s1 + $0x698] sm:$0xff]  ;;  %3232 = vst [vmem:[%s6413_s2 + $0xe88] sm:$0xff] %v3231_v17  ;;  %v3237_v20 = vld [vmem:[%s6414_s1 + $0x6a0] sm:$0xff] }
  0xeb   :  { %3234 = vst [vmem:[%s6413_s2 + $0xe90] sm:$0xff] %v3233_v18  ;;  %3236 = vst [vmem:[%s6413_s2 + $0xe98] sm:$0xff] %v3235_v19  ;;  %v3239_v21 = vld [vmem:[%s6414_s1 + $0x6a8] sm:$0xff]  ;;  %v3241_v22 = vld [vmem:[%s6414_s1 + $0x6b0] sm:$0xff] }
  0xec   :  { %3238 = vst [vmem:[%s6413_s2 + $0xea0] sm:$0xff] %v3237_v20  ;;  %3240 = vst [vmem:[%s6413_s2 + $0xea8] sm:$0xff] %v3239_v21  ;;  %v3243_v23 = vld [vmem:[%s6414_s1 + $0x6b8] sm:$0xff]  ;;  %v3245_v24 = vld [vmem:[%s6414_s1 + $0x6c0] sm:$0xff] }
  0xed   :  { %3242 = vst [vmem:[%s6413_s2 + $0xeb0] sm:$0xff] %v3241_v22  ;;  %v3247_v25 = vld [vmem:[%s6414_s1 + $0x6c8] sm:$0xff]  ;;  %3244 = vst [vmem:[%s6413_s2 + $0xeb8] sm:$0xff] %v3243_v23  ;;  %v3249_v26 = vld [vmem:[%s6414_s1 + $0x6d0] sm:$0xff] }
  0xee   :  { %3246 = vst [vmem:[%s6413_s2 + $0xec0] sm:$0xff] %v3245_v24  ;;  %3248 = vst [vmem:[%s6413_s2 + $0xec8] sm:$0xff] %v3247_v25  ;;  %v3251_v27 = vld [vmem:[%s6414_s1 + $0x6d8] sm:$0xff]  ;;  %v3253_v28 = vld [vmem:[%s6414_s1 + $0x6e0] sm:$0xff] }
  0xef   :  { %3250 = vst [vmem:[%s6413_s2 + $0xed0] sm:$0xff] %v3249_v26  ;;  %3252 = vst [vmem:[%s6413_s2 + $0xed8] sm:$0xff] %v3251_v27  ;;  %v3255_v29 = vld [vmem:[%s6414_s1 + $0x6e8] sm:$0xff]  ;;  %v3257_v30 = vld [vmem:[%s6414_s1 + $0x6f0] sm:$0xff] }
  0xf0   :  { %3254 = vst [vmem:[%s6413_s2 + $0xee0] sm:$0xff] %v3253_v28  ;;  %v3259_v31 = vld [vmem:[%s6414_s1 + $0x6f8] sm:$0xff]  ;;  %3256 = vst [vmem:[%s6413_s2 + $0xee8] sm:$0xff] %v3255_v29  ;;  %v3261_v32 = vld [vmem:[%s6414_s1 + $0x700] sm:$0xff] }
  0xf1   :  { %3258 = vst [vmem:[%s6413_s2 + $0xef0] sm:$0xff] %v3257_v30  ;;  %3260 = vst [vmem:[%s6413_s2 + $0xef8] sm:$0xff] %v3259_v31  ;;  %v3263_v33 = vld [vmem:[%s6414_s1 + $0x708] sm:$0xff]  ;;  %v3265_v34 = vld [vmem:[%s6414_s1 + $0x710] sm:$0xff] }
  0xf2   :  { %3262 = vst [vmem:[%s6413_s2 + $0xf00] sm:$0xff] %v3261_v32  ;;  %3264 = vst [vmem:[%s6413_s2 + $0xf08] sm:$0xff] %v3263_v33  ;;  %v3267_v35 = vld [vmem:[%s6414_s1 + $0x718] sm:$0xff]  ;;  %v3269_v36 = vld [vmem:[%s6414_s1 + $0x720] sm:$0xff] }
  0xf3   :  { %3266 = vst [vmem:[%s6413_s2 + $0xf10] sm:$0xff] %v3265_v34  ;;  %v3271_v37 = vld [vmem:[%s6414_s1 + $0x728] sm:$0xff]  ;;  %3268 = vst [vmem:[%s6413_s2 + $0xf18] sm:$0xff] %v3267_v35  ;;  %v3273_v38 = vld [vmem:[%s6414_s1 + $0x730] sm:$0xff] }
  0xf4   :  { %3270 = vst [vmem:[%s6413_s2 + $0xf20] sm:$0xff] %v3269_v36  ;;  %3272 = vst [vmem:[%s6413_s2 + $0xf28] sm:$0xff] %v3271_v37  ;;  %v3275_v39 = vld [vmem:[%s6414_s1 + $0x738] sm:$0xff]  ;;  %v3277_v40 = vld [vmem:[%s6414_s1 + $0x740] sm:$0xff] }
  0xf5   :  { %3274 = vst [vmem:[%s6413_s2 + $0xf30] sm:$0xff] %v3273_v38  ;;  %3276 = vst [vmem:[%s6413_s2 + $0xf38] sm:$0xff] %v3275_v39  ;;  %v3279_v41 = vld [vmem:[%s6414_s1 + $0x748] sm:$0xff]  ;;  %v3281_v42 = vld [vmem:[%s6414_s1 + $0x750] sm:$0xff] }
  0xf6   :  { %3278 = vst [vmem:[%s6413_s2 + $0xf40] sm:$0xff] %v3277_v40  ;;  %v3283_v43 = vld [vmem:[%s6414_s1 + $0x758] sm:$0xff]  ;;  %3280 = vst [vmem:[%s6413_s2 + $0xf48] sm:$0xff] %v3279_v41  ;;  %v3285_v44 = vld [vmem:[%s6414_s1 + $0x760] sm:$0xff] }
  0xf7   :  { %3282 = vst [vmem:[%s6413_s2 + $0xf50] sm:$0xff] %v3281_v42  ;;  %3284 = vst [vmem:[%s6413_s2 + $0xf58] sm:$0xff] %v3283_v43  ;;  %v3287_v45 = vld [vmem:[%s6414_s1 + $0x768] sm:$0xff]  ;;  %v3289_v46 = vld [vmem:[%s6414_s1 + $0x770] sm:$0xff] }
  0xf8   :  { %3286 = vst [vmem:[%s6413_s2 + $0xf60] sm:$0xff] %v3285_v44  ;;  %3288 = vst [vmem:[%s6413_s2 + $0xf68] sm:$0xff] %v3287_v45  ;;  %v3291_v47 = vld [vmem:[%s6414_s1 + $0x778] sm:$0xff]  ;;  %v3293_v48 = vld [vmem:[%s6414_s1 + $0x780] sm:$0xff] }
  0xf9   :  { %3290 = vst [vmem:[%s6413_s2 + $0xf70] sm:$0xff] %v3289_v46  ;;  %v3295_v49 = vld [vmem:[%s6414_s1 + $0x788] sm:$0xff]  ;;  %3292 = vst [vmem:[%s6413_s2 + $0xf78] sm:$0xff] %v3291_v47  ;;  %v3297_v50 = vld [vmem:[%s6414_s1 + $0x790] sm:$0xff] }
  0xfa   :  { %3294 = vst [vmem:[%s6413_s2 + $0xf80] sm:$0xff] %v3293_v48  ;;  %3296 = vst [vmem:[%s6413_s2 + $0xf88] sm:$0xff] %v3295_v49  ;;  %v3299_v51 = vld [vmem:[%s6414_s1 + $0x798] sm:$0xff]  ;;  %v3301_v52 = vld [vmem:[%s6414_s1 + $0x7a0] sm:$0xff] }
  0xfb   :  { %3298 = vst [vmem:[%s6413_s2 + $0xf90] sm:$0xff] %v3297_v50  ;;  %3300 = vst [vmem:[%s6413_s2 + $0xf98] sm:$0xff] %v3299_v51  ;;  %v3303_v53 = vld [vmem:[%s6414_s1 + $0x7a8] sm:$0xff]  ;;  %v3305_v54 = vld [vmem:[%s6414_s1 + $0x7b0] sm:$0xff] }
  0xfc   :  { %3302 = vst [vmem:[%s6413_s2 + $0xfa0] sm:$0xff] %v3301_v52  ;;  %v3307_v55 = vld [vmem:[%s6414_s1 + $0x7b8] sm:$0xff]  ;;  %3304 = vst [vmem:[%s6413_s2 + $0xfa8] sm:$0xff] %v3303_v53  ;;  %v3309_v56 = vld [vmem:[%s6414_s1 + $0x7c0] sm:$0xff] }
  0xfd   :  { %3306 = vst [vmem:[%s6413_s2 + $0xfb0] sm:$0xff] %v3305_v54  ;;  %3308 = vst [vmem:[%s6413_s2 + $0xfb8] sm:$0xff] %v3307_v55  ;;  %v3311_v57 = vld [vmem:[%s6414_s1 + $0x7c8] sm:$0xff]  ;;  %v3313_v58 = vld [vmem:[%s6414_s1 + $0x7d0] sm:$0xff] }
  0xfe   :  { %3310 = vst [vmem:[%s6413_s2 + $0xfc0] sm:$0xff] %v3309_v56  ;;  %3312 = vst [vmem:[%s6413_s2 + $0xfc8] sm:$0xff] %v3311_v57  ;;  %v3315_v59 = vld [vmem:[%s6414_s1 + $0x7d8] sm:$0xff]  ;;  %v3317_v60 = vld [vmem:[%s6414_s1 + $0x7e0] sm:$0xff] }
  0xff   :  { %3314 = vst [vmem:[%s6413_s2 + $0xfd0] sm:$0xff] %v3313_v58  ;;  %v3319_v61 = vld [vmem:[%s6414_s1 + $0x7e8] sm:$0xff]  ;;  %3316 = vst [vmem:[%s6413_s2 + $0xfd8] sm:$0xff] %v3315_v59  ;;  %v3321_v62 = vld [vmem:[%s6414_s1 + $0x7f0] sm:$0xff] }
 0x100   :  { %3318 = vst [vmem:[%s6413_s2 + $0xfe0] sm:$0xff] %v3317_v60  ;;  %3320 = vst [vmem:[%s6413_s2 + $0xfe8] sm:$0xff] %v3319_v61  ;;  %v3323_v63 = vld [vmem:[%s6414_s1 + $0x7f8] sm:$0xff] }
 0x101   :  { %3322 = vst [vmem:[%s6413_s2 + $0xff0] sm:$0xff] %v3321_v62  ;;  %3324 = vst [vmem:[%s6413_s2 + $0xff8] sm:$0xff] %v3323_v63 }

// kernel: cup2_forward.1
= control target key start
LH: loop header
LB: loop body
LE: loop exit
PB: predicated region body
PF: predicated region fallthrough
CT: control target
= control target key end

     0   :  { %s732_s12 = smov 0   ;;  %s836_s0 = inlined_call_operand.vmem [shape: bf16[2,8,290], index: 0, kind: input, shape index: {}]   ;;  %s837_s1 = inlined_call_operand.vmem [shape: bf16[32,72], index: 1, kind: input, shape index: {}]   ;;  %s838_s2 = inlined_call_operand.vmem [shape: f32[32,1], index: 2, kind: input, shape index: {}]   ;;  %s839_s3 = inlined_call_operand.vmem [shape: f32[2,32,256], index: 3, kind: output, shape index: {}]  }
   0x1 LB: > { %s590_s13 = sadd.s32 4294967295, %s701_s12   ;;  %p594_p0 = scmp.ge.s32.totalorder %s701_s12, 1  ;;  %s701_s12 = sphi %s732_s12, %s13_s12  }
   0x2   : > { %p137_p1 = scmp.lt.s32.totalorder %s701_s12, 3 }
   0x4   : > { %p138_p2 = pnand %p594_p0, %p137_p1 }
   0x5   : > { %p161_p3 = scmp.lt.s32.totalorder (!%p138_p2), %s590_s13, 1  ;;  %v174_v0 = vlaneseq (!%p138_p2)  ;;  %s703_s18 = smov (!%p138_p2), 127   ;;  %v710_v17 = vmov (!%p138_p2), 0   ;;  %v381_v18 = vld [vmem:[%s838_s2] sm:$0xff] (!%p138_p2)  ;;  %v382_v19 = vld [vmem:[%s838_s2 + $0x8] sm:$0xff] (!%p138_p2)  ;;  %v384_v20 = vld [vmem:[%s838_s2 + $0x18] sm:$0xff] (!%p138_p2) }
   0x6   : > { %141 = sbr.rel (%p138_p2) target bundleno = 393 (0x189), region = 32  ;;  %s704_s19 = smov (!%p138_p2), 126   ;;  %506 = vmatprep.mubr.bf16.mxu0 (!%p138_p2), %v710_v17  ;;  %516 = vmatprep.mubr.bf16.mxu1 (!%p138_p2), %v710_v17  ;;  %v383_v21 = vld [vmem:[%s838_s2 + $0x10] sm:$0xff] (!%p138_p2)  ;;  %vm226_vm2 = vcmask (!%p138_p2), 1043456   ;;  %vm228_vm3 = vcmask (!%p138_p2), 1039360   ;;  %vm242_vm4 = vcmask (!%p138_p2), 1031168  }
   0x7   : > { %v742_v1 = vand.u32 (!%p138_p2), 127, %v174_v0  ;;  %s705_s20 = smov (!%p138_p2), 112   ;;  %s706_s21 = smov (!%p138_p2), 111   ;;  %692 = vset.pattern.permute.xlu1 (!%p138_p2), %v710_v17  ;;  %691 = vset.pattern.permute.xlu0 (!%p138_p2), %v710_v17  ;;  %vm264_vm5 = vcmask (!%p138_p2), 916480   ;;  %vm297_vm10 = vcmask (!%p138_p2), 900096   ;;  %vm287_vm11 = vcmask (!%p138_p2), 908288  }
   0x8   : > { %s707_s22 = smov (!%p138_p2), 110   ;;  %s708_s23 = smov (!%p138_p2), 96   ;;  %vm319_vm12 = vcmask (!%p138_p2), 785408   ;;  %vm352_vm13 = vcmask (!%p138_p2), 769024   ;;  %vm342_vm14 = vcmask (!%p138_p2), 777216   ;;  %vm460_vm15 = vcmask (!%p138_p2), 588800  }
   0x9   : > { %v746_v2 = vadd.s32 (!%p138_p2), 128, %v742_v1  ;;  %v181_v3 = vand.u32 (!%p138_p2), 15, %v742_v1  ;;  %s709_s24 = smov (!%p138_p2), 95   ;;  %s711_s25 = smov (!%p138_p2), 94  }
   0xb   : > { %v188_v4 = vand.u32 (!%p138_p2), 15, %v746_v2  ;;  %vm755_vm0 = vcmp.ge.s32.totalorder (!%p138_p2), %v181_v3, 1  ;;  %vm790_vm7 = vcmp.le.s32.totalorder (!%p138_p2), %v181_v3, 14 }
   0xc   : > { %vm635_vm9 = vmpackc.low (!%p138_p2), %vm755_vm0, %vm790_vm7 }
   0xd   : > { %s849_s13 = smov (!%p161_p3, %s590_s13), 1  ;;  %vm761_vm1 = vcmp.ge.s32.totalorder %v188_v4, 1  ;;  %vm784_vm6 = vcmp.le.s32.totalorder %v188_v4, 14 }
   0xe   : > { %s648_s14 = smul.u32 12, %s849_s13  ;;  %vm632_vm8 = vmpackc.low %vm761_vm1, %vm784_vm6  ;;  %s621_s11 = sshll.u32 %s849_s13, 6 }
   0xf   : > { %s170_s16 = scalar_lea.vmem %s839_s3, %s621_s11 }
  0x10   : > { %s165_s17 = scalar_lea.vmem %s836_s0, %s648_s14 }
  0x11   : > { %v172_v5 = vld [vmem:[%s165_s17] sm:$0xff]  ;;  %v173_v6 = vld [vmem:[%s165_s17 + $0x8] sm:$0xf] }
  0x12   : > { %220 = vrot.lane.b32.xlu0 %v172_v5, %s703_s18  ;;  %v206_v7 = vunpack.c.h.bf16 %v172_v5  ;;  %v232_v8 = vunpack.c.l.bf16 %v173_v6  ;;  %v205_v11 = vunpack.c.l.bf16 %v172_v5 }
  0x14   : > { %v666_v12 = vpack.i.bf16 %v232_v8, %v206_v7  ;;  %v207_v13 = vsel %vm755_vm0, %v205_v11, 0.0  ;;  %v208_v14 = vsel %vm761_vm1, %v206_v7, 0.0  ;;  %v676_v16 = vpack.i.bf16 %v206_v7, %v205_v11 }
  0x15   : > { %v622_v15 = vpack.c.bf16 %v208_v14, %v207_v13 }
  0x16   : > { %222 = vrot.lane.b32.xlu0 %v173_v6, %s703_s18  ;;  %667 = vrot.lane.b32.xlu1 %v666_v12, %s704_s19 }
  0x1a   : > { %672 = vrot.lane.b32.xlu1 %v666_v12, %s705_s20  ;;  %236 = vrot.lane.b32.xlu0 %v205_v11, %s704_s19 }
  0x1e   : > { %258 = vrot.lane.b32.xlu1 %v205_v11, %s705_s20  ;;  %280 = vrot.lane.b32.xlu0 %v172_v5, %s706_s21 }
  0x22   : > { %282 = vrot.lane.b32.xlu1 %v173_v6, %s706_s21  ;;  %677 = vrot.lane.b32.xlu0 %v676_v16, %s707_s22 }
  0x26   : > { %295 = vrot.lane.b32.xlu1 %v232_v8, %s707_s22  ;;  %682 = vrot.lane.b32.xlu0 %v676_v16, %s708_s23 }
  0x2a   : > { %317 = vrot.lane.b32.xlu1 %v232_v8, %s708_s23  ;;  %335 = vrot.lane.b32.xlu0 %v172_v5, %s709_s24 }
  0x2e   : > { %337 = vrot.lane.b32.xlu1 %v173_v6, %s709_s24  ;;  %687 = vrot.lane.b32.xlu0 %v676_v16, %s711_s25 }
  0x32   : > { %350 = vrot.lane.b32.xlu1 %v232_v8, %s711_s25  ;;  %387 = vperm.xlu0 %691, %v381_v18  }
  0x36   : > { %392 = vperm.xlu1 %692, %v382_v19   ;;  %402 = vperm.xlu0 %691, %v384_v20  }
  0x3a   : > { %397 = vperm.xlu1 %692, %v383_v21  }
  0x84   : > { %v221_v22 = vpop.permute.xlu0 %220 }
  0x85   : > { %v224_v23 = vrot.slane %v221_v22, 4 }
  0x88   : > { %v223_v24 = vpop.permute.xlu0 %222  ;;  %v668_v25 = vpop.permute.xlu1 %667 }
  0x89   : > { %v225_v26 = vrot.slane %v223_v24, 4  ;;  %v670_v27 = vunpack.i.h.bf16 %v668_v25  ;;  %v669_v28 = vunpack.i.l.bf16 %v668_v25 }
  0x8b   : > { %v227_v29 = vsel %vm226_vm2, %v224_v23, %v225_v26  ;;  %v244_v39 = vsel %vm242_vm4, %v669_v28, %v670_v27  ;;  %v693_v27 = vld [vmem:[%s837_s1] sm:$0xff]  }
  0x8c   : > { %v673_v30 = vpop.permute.xlu1 %672  ;;  %v237_v31 = vpop.permute.xlu0 %236  ;;  %v229_v32 = vsel %vm228_vm3, %v221_v22, %v227_v29 }
  0x8d   : > { %v675_v34 = vunpack.i.h.bf16 %v673_v30  ;;  %v674_v35 = vunpack.i.l.bf16 %v673_v30  ;;  %v607_v36 = vcombine.high %v622_v15, %v229_v32  ;;  %v606_v37 = vcombine.low %v622_v15, %v229_v32 }
  0x8e   : > { %v243_v44 = vsel %vm242_vm4, %v237_v31, %v669_v28  ;;  %v694_v28 = vld [vmem:[%s837_s1 + $0x8] sm:$0xff]  }
  0x8f   : > { %474 = vmatprep.subr.bf16.mxu0 %v607_v36  ;;  %638 = vmatprep.subr.bf16.mxu1 %v607_v36  ;;  %v266_v40 = vsel %vm264_vm5, %v674_v35, %v675_v34 }
  0x90   : > { %v633_v41 = vpack.c.bf16 %v266_v40, %v244_v39  ;;  %v259_v42 = vpop.permute.xlu1 %258  ;;  %475 = vmatpush1.bf16.msra.mxu0 %v606_v37  ;;  %643 = vmatpush1.bf16.msra.mxu1 %v606_v37  ;;  %v281_v43 = vpop.permute.xlu0 %280 }
  0x91   : > { %v265_v45 = vsel %vm264_vm5, %v259_v42, %v674_v35  ;;  %v284_v49 = vrot.slane %v281_v43, 4 }
  0x92   : > { %v636_v46 = vpack.c.bf16 %v265_v45, %v243_v44  ;;  %634 = vmatprep.subr.msk.bf16.mxu0 %vm632_vm8, %v633_v41  ;;  %639 = vmatprep.subr.msk.bf16.mxu1 %vm632_vm8, %v633_v41 }
  0x94   : > { %v283_v47 = vpop.permute.xlu1 %282  ;;  %637 = vmatpush1.bf16.msk.msra.mxu0 %vm635_vm9, %v636_v46  ;;  %644 = vmatpush1.bf16.msk.msra.mxu1 %vm635_vm9, %v636_v46  ;;  %v678_v48 = vpop.permute.xlu0 %677 }
  0x95   : > { %v285_v50 = vrot.slane %v283_v47, 4  ;;  %v680_v51 = vunpack.i.h.bf16 %v678_v48  ;;  %v679_v52 = vunpack.i.l.bf16 %v678_v48 }
  0x97   : > { %v298_v53 = vsel %vm297_vm10, %v679_v52, %v680_v51  ;;  %v286_v57 = vsel %vm226_vm2, %v284_v49, %v285_v50 }
  0x98   : > { %v296_v54 = vpop.permute.xlu1 %295  ;;  %v302_v55 = vsel %vm790_vm7, %v298_v53, 0.0  ;;  %v683_v56 = vpop.permute.xlu0 %682  ;;  %v288_v0 = vsel %vm287_vm11, %v281_v43, %v286_v57 }
  0x99   : > { %v299_v58 = vsel %vm297_vm10, %v680_v51, %v296_v54  ;;  %v685_v59 = vunpack.i.h.bf16 %v683_v56  ;;  %v684_v60 = vunpack.i.l.bf16 %v683_v56 }
  0x9a   : > { %v303_v61 = vsel %vm784_vm6, %v299_v58, 0.0 }
  0x9b   : > { %v625_v62 = vpack.c.bf16 %v303_v61, %v302_v55  ;;  %v320_v2 = vsel %vm319_vm12, %v684_v60, %v685_v59 }
  0x9c   : > { %v318_v63 = vpop.permute.xlu1 %317  ;;  %v336_v1 = vpop.permute.xlu0 %335  ;;  %v324_v7 = vsel %vm755_vm0, %v320_v2, 0.0 }
  0x9d   : > { %v321_v3 = vsel %vm319_vm12, %v685_v59, %v318_v63  ;;  %v611_v4 = vcombine.high %v288_v0, %v625_v62  ;;  %v610_v5 = vcombine.low %v288_v0, %v625_v62  ;;  %v339_v6 = vrot.slane %v336_v1, 4 }
  0x9e   : > { %v325_v8 = vsel %vm761_vm1, %v321_v3, 0.0 }
  0x9f   : > { %478 = vmatprep.subr.bf16.mxu0 %v611_v4  ;;  %640 = vmatprep.subr.bf16.mxu1 %v611_v4  ;;  %v626_v16 = vpack.c.bf16 %v325_v8, %v324_v7 }
  0xa0   : > { %v338_v11 = vpop.permute.xlu1 %337  ;;  %479 = vmatpush1.bf16.msra.mxu0 %v610_v5  ;;  %645 = vmatpush1.bf16.msra.mxu1 %v610_v5  ;;  %v688_v12 = vpop.permute.xlu0 %687 }
  0xa1   : > { %v340_v13 = vrot.slane %v338_v11, 4  ;;  %v690_v14 = vunpack.i.h.bf16 %v688_v12  ;;  %v689_v15 = vunpack.i.l.bf16 %v688_v12 }
  0xa3   : > { %v341_v17 = vsel %vm226_vm2, %v339_v6, %v340_v13  ;;  %v353_v18 = vsel %vm352_vm13, %v689_v15, %v690_v14 }
  0xa4   : > { %v343_v19 = vsel %vm342_vm14, %v336_v1, %v341_v17  ;;  %v351_v20 = vpop.permute.xlu1 %350  ;;  %v357_v9 = vsel %vm790_vm7, %v353_v18, 0.0 }
  0xa5   : > { %v612_v10 = vcombine.low %v626_v16, %v343_v19  ;;  %v613_v21 = vcombine.high %v626_v16, %v343_v19  ;;  %v354_v22 = vsel %vm352_vm13, %v690_v14, %v351_v20  ;;  %v630_v23 = vpack.c.bf16 %v357_v9, %v357_v9 }
  0xa6   : > { %v358_v24 = vsel %vm784_vm6, %v354_v22, 0.0 }
  0xa7   : > { %v631_v25 = vpack.c.bf16 %v358_v24, %v358_v24  ;;  %480 = vmatprep.subr.bf16.mxu0 %v613_v21  ;;  %641 = vmatprep.subr.bf16.mxu1 %v613_v21  ;;  %v469_v26 = vsel %vm226_vm2, %v630_v23, 0 }
  0xa8   : > { %481 = vmatpush1.bf16.msra.mxu0 %v612_v10  ;;  %646 = vmatpush1.bf16.msra.mxu1 %v612_v10 }
  0xa9   : > { %616 = vmatprep.subr.msk.bf16.mxu0 %vm226_vm2, %v631_v25  ;;  %642 = vmatprep.subr.msk.bf16.mxu1 %vm226_vm2, %v631_v25 }
  0xac   : > { %483 = vmatpush1.bf16.msra.mxu0 %v469_v26  ;;  %647 = vmatpush1.bf16.msra.mxu1 %v469_v26 }
  0xaf   : > { %617 = vmatmul.mubr.msk.bf16.vlgmr.msra.gmra.mrb[0].mxu0 %vm460_vm15, %v693_v27  ;;  %618 = vmatmul.mubr.msk.bf16.vlgmr.msra.gmra.mrb[0].mxu1 %vm460_vm15, %v694_v28 }
  0xb1   : > { %v388_v30 = vpop.permute.xlu0 %387 }
  0xb5   : > { %v393_v29 = vpop.permute.xlu1 %392  ;;  %v403_v32 = vpop.permute.xlu0 %402 }
  0xb9   : > { %v398_v31 = vpop.permute.xlu1 %397 }
 0x182   : > { %v508_v33 = vpop.f32.mrb[0].mxu0  ;;  %v518_v34 = vpop.f32.mrb[0].mxu1 }
 0x183   : > { %v509_v35 = vadd.f32 %v508_v33, %v388_v30  ;;  %v519_v36 = vadd.f32 %v518_v34, %v398_v31  ;;  %v510_v37 = vpop.f32.mrb[1].mxu0  ;;  %v520_v38 = vpop.f32.mrb[1].mxu1 }
 0x184   : > { %v511_v39 = vadd.f32 %v510_v37, %v388_v30  ;;  %v521_v40 = vadd.f32 %v520_v38, %v398_v31  ;;  %v512_v41 = vpop.f32.mrb[2].mxu0  ;;  %v522_v42 = vpop.f32.mrb[2].mxu1 }
 0x185   : > { %527 = vst [vmem:[%s170_s16] sm:$0xff] %v509_v35  ;;  %531 = vst [vmem:[%s170_s16 + $0x20] sm:$0xff] %v519_v36  ;;  %v513_v43 = vadd.f32 %v512_v41, %v393_v29  ;;  %v523_v44 = vadd.f32 %v522_v42, %v403_v32  ;;  %v514_v45 = vpop.f32.mrb[3].mxu0  ;;  %v524_v46 = vpop.f32.mrb[3].mxu1 }
 0x186   : > { %528 = vst [vmem:[%s170_s16 + $0x8] sm:$0xff] %v511_v39  ;;  %532 = vst [vmem:[%s170_s16 + $0x28] sm:$0xff] %v521_v40  ;;  %v515_v47 = vadd.f32 %v514_v45, %v393_v29  ;;  %v525_v48 = vadd.f32 %v524_v46, %v403_v32 }
 0x187   : > { %529 = vst [vmem:[%s170_s16 + $0x10] sm:$0xff] %v513_v43  ;;  %533 = vst [vmem:[%s170_s16 + $0x30] sm:$0xff] %v523_v44 }
 0x188   : > { %530 = vst [vmem:[%s170_s16 + $0x18] sm:$0xff] %v515_v47  ;;  %534 = vst [vmem:[%s170_s16 + $0x38] sm:$0xff] %v525_v48 }
 0x189 PF: > { %s13_s12 = sadd.s32 1, %s701_s12  }
 0x18a   : > { %p10_p4 = scmp.ge.s32.totalorder %s13_s12, 4  }
 0x18c   :  { %12 = sbr.rel (!%p10_p4) target bundleno = 1 (0x1), region = 62 }

</bundles_post_ra>
